<compile_context>
chip_gen: v7x
topology: tpu7x:2x2x1
jax: 0.10.0
libtpu: 0.0.40
codegen_flags: <defaults>
</compile_context>

<pallas_src>
import functools

import jax
import jax.numpy as jnp
from jax.experimental import pallas as pl
from jax.experimental.pallas import tpu as pltpu

INPUT_DIM = 784
HIDDEN_DIMS = (128, 64)
OUTPUT_DIM = 10
OUT_PAD = 128  # lane-dense padded output width


def _round_up(n, m):
    return ((n + m - 1) // m) * m


def mlp_kernel(x_ref, w1_ref, b1_ref, w2_ref, b2_ref, w3_ref, b3_ref, o_ref):
    # x arrives f32 (no wrapper-side cast copy); cast to bf16 for the MXU here.
    x = x_ref[...].astype(jnp.bfloat16)
    # Layer 1: Linear + ReLU  (bf16 MXU matmul, f32 accumulate, f32 bias)
    h1 = jnp.dot(x, w1_ref[...], preferred_element_type=jnp.float32)
    h1 = jnp.maximum(h1 + b1_ref[...], 0.0).astype(jnp.bfloat16)
    # Layer 2: Linear + ReLU
    h2 = jnp.dot(h1, w2_ref[...], preferred_element_type=jnp.float32)
    h2 = jnp.maximum(h2 + b2_ref[...], 0.0).astype(jnp.bfloat16)
    # Layer 3: Linear (no activation); output cols 10..127 hit zero weights/bias
    out = jnp.dot(h2, w3_ref[...], preferred_element_type=jnp.float32)
    o_ref[...] = (out + b3_ref[...]).astype(o_ref.dtype)


@functools.partial(jax.jit, static_argnames=("block_b",))
def mlp_forward(x, params, block_b=2048):
    w1, b1, w2, b2, w3, b3 = params
    # torch: x = x.view(-1, 784)   (no dtype cast, no pad copy of x)
    x2d = x.reshape(-1, INPUT_DIM)
    B = x2d.shape[0]

    # Weights are tiny: bf16 cast + output padding cost is negligible HBM
    # traffic and they are fetched into VMEM exactly once (constant index_map).
    w1b = w1.astype(jnp.bfloat16)
    w2b = w2.astype(jnp.bfloat16)
    w3b = w3.astype(jnp.bfloat16)
    pad_out = OUT_PAD - OUTPUT_DIM
    w3p = jnp.pad(w3b, ((0, 0), (0, pad_out)))
    b3p = jnp.pad(b3, ((0, 0), (0, pad_out)))

    # Batch tile: large (amortize the ~0.35us/step overhead) but guarantee at
    # least 2 grid steps when possible so both v7x TensorCores get work.
    # Multiple of 16 (bf16 sublane packing for intermediates/output).
    block = max(16, min(block_b, _round_up(pl.cdiv(max(B, 1), 2), 16)))
    grid = (pl.cdiv(B, block),)  # last block may be partial; writeback is masked

    # Weights/biases: constant index_map -> fetched once, VMEM-resident.
    def full_spec(shape):
        return pl.BlockSpec(shape, lambda i: (0,) * len(shape))

    out = pl.pallas_call(
        mlp_kernel,
        out_shape=jax.ShapeDtypeStruct((B, OUT_PAD), jnp.bfloat16),
        grid_spec=pltpu.PrefetchScalarGridSpec(
            num_scalar_prefetch=0,
            grid=grid,
            in_specs=[
                pl.BlockSpec((block, INPUT_DIM), lambda i: (i, 0)),  # x streams (f32)
                full_spec(w1b.shape),
                full_spec(b1.shape),
                full_spec(w2b.shape),
                full_spec(b2.shape),
                full_spec(w3p.shape),
                full_spec(b3p.shape),
            ],
            out_specs=pl.BlockSpec((block, OUT_PAD), lambda i: (i, 0)),
        ),
        compiler_params=pltpu.CompilerParams(
            dimension_semantics=("parallel",),
            # Double-buffered f32 x tiles at block=2048 (~12.5 MiB) plus
            # intermediates exceed v5e's 16 MiB scoped default; raise it.
            vmem_limit_bytes=48 * 1024 * 1024,
        ),
    )(x2d, w1b, b1, w2b, b2, w3p, b3p)

    # Drop lane padding on the output features and upcast to f32 (tiny op).
    return out[:, :OUTPUT_DIM].astype(jnp.float32)


def init_params(key):
    """Deterministic parameter init; shapes mirror nn.Linear layers (stored as
    (in_features, out_features) so the kernel does x @ W + b)."""
    k1, k2, k3, k4, k5, k6 = jax.random.split(key, 6)
    d_in, (h1, h2), d_out = INPUT_DIM, HIDDEN_DIMS, OUTPUT_DIM

    def u(k, shape, fan_in):
        bound = 1.0 / jnp.sqrt(fan_in)
        return jax.random.uniform(k, shape, jnp.float32, -bound, bound)

    w1 = u(k1, (d_in, h1), d_in)
    b1 = u(k2, (1, h1), d_in)   # kept 2-D for clean VMEM layout / broadcast
    w2 = u(k3, (h1, h2), h1)
    b2 = u(k4, (1, h2), h1)
    w3 = u(k5, (h2, d_out), h2)
    b3 = u(k6, (1, d_out), h2)
    return (w1, b1, w2, b2, w3, b3)


def mlp_reference(x, params):
    """Pure-JAX f32 reference for correctness check."""
    w1, b1, w2, b2, w3, b3 = params
    h = x.reshape(-1, INPUT_DIM)
    h = jnp.maximum(h @ w1 + b1, 0.0)
    h = jnp.maximum(h @ w2 + b2, 0.0)
    return h @ w3 + b3


if __name__ == "__main__":
    key = jax.random.PRNGKey(0)
    kp, kx = jax.random.split(key)
    params = init_params(kp)

    # MNIST-like NCHW input. Batch 300 exercises the >=2-step grid split
    # (block=160) plus the masked partial last tile (rows 160..299 valid).
    x = jax.random.normal(kx, (300, 1, 28, 28), jnp.float32)

    out = mlp_forward(x, params)
    out = jax.block_until_ready(out)

    ref = mlp_reference(x, params)
    assert out.shape == (300, OUTPUT_DIM), out.shape
    # bf16 inputs/weights/output with f32 accumulation: loosened tolerance.
    assert jnp.allclose(out, ref, atol=5e-2, rtol=2e-2), "mismatch vs reference"

    print("KERNEL_OK")
</pallas_src>

<mosaic_0001>
module attributes {stable_mosaic.version = 11 : i64} {
  func.func @mlp_kernel(%arg0: i32, %arg1: memref<160x784xf32, #tpu.memory_space<vmem>>, %arg2: memref<784x128xbf16, #tpu.memory_space<vmem>>, %arg3: memref<1x128xf32, #tpu.memory_space<vmem>>, %arg4: memref<128x64xbf16, #tpu.memory_space<vmem>>, %arg5: memref<1x64xf32, #tpu.memory_space<vmem>>, %arg6: memref<64x128xbf16, #tpu.memory_space<vmem>>, %arg7: memref<1x128xf32, #tpu.memory_space<vmem>>, %arg8: memref<160x128xbf16, #tpu.memory_space<vmem>>) attributes {dimension_semantics = [#tpu.dimension_semantics<parallel>], iteration_bounds = array<i64: 2>, scalar_prefetch = 0 : i64, scratch_operands = 0 : i64, tpu.core_type = #tpu.core_type<tc>, window_params = [{transform_indices = @transform_0, window_bounds = array<i64: 160, 784>}, {pipeline_mode = #tpu.pipeline_mode<synchronous>, transform_indices = @transform_1, window_bounds = array<i64: 784, 128>}, {pipeline_mode = #tpu.pipeline_mode<synchronous>, transform_indices = @transform_2, window_bounds = array<i64: 1, 128>}, {pipeline_mode = #tpu.pipeline_mode<synchronous>, transform_indices = @transform_3, window_bounds = array<i64: 128, 64>}, {pipeline_mode = #tpu.pipeline_mode<synchronous>, transform_indices = @transform_4, window_bounds = array<i64: 1, 64>}, {pipeline_mode = #tpu.pipeline_mode<synchronous>, transform_indices = @transform_5, window_bounds = array<i64: 64, 128>}, {pipeline_mode = #tpu.pipeline_mode<synchronous>, transform_indices = @transform_6, window_bounds = array<i64: 1, 128>}, {transform_indices = @transform_7, window_bounds = array<i64: 160, 128>}]} {
    %c0 = arith.constant 0 : index
    %c0_0 = arith.constant 0 : index
    %0 = vector.load %arg1[%c0, %c0_0] : memref<160x784xf32, #tpu.memory_space<vmem>>, vector<160x784xf32>
    %1 = arith.truncf %0 : vector<160x784xf32> to vector<160x784xbf16>
    %c0_1 = arith.constant 0 : index
    %c0_2 = arith.constant 0 : index
    %2 = vector.load %arg2[%c0_1, %c0_2] : memref<784x128xbf16, #tpu.memory_space<vmem>>, vector<784x128xbf16>
    %cst = arith.constant dense<0.000000e+00> : vector<160x128xf32>
    %3 = tpu.matmul %1, %2, %cst {dimension_numbers = #tpu.dot_dimension_numbers<[1], [0], [0], [1], [0, 0, 1, 1], [], []>} : vector<160x784xbf16>, vector<784x128xbf16>, vector<160x128xf32> -> vector<160x128xf32>
    %c0_3 = arith.constant 0 : index
    %c0_4 = arith.constant 0 : index
    %4 = vector.load %arg3[%c0_3, %c0_4] : memref<1x128xf32, #tpu.memory_space<vmem>>, vector<1x128xf32>
    %5 = vector.broadcast %4 : vector<1x128xf32> to vector<160x128xf32>
    %6 = arith.addf %3, %5 : vector<160x128xf32>
    %cst_5 = arith.constant 0.000000e+00 : f32
    %7 = vector.broadcast %cst_5 : f32 to vector<160x128xf32>
    %8 = arith.maximumf %6, %7 : vector<160x128xf32>
    %9 = arith.truncf %8 : vector<160x128xf32> to vector<160x128xbf16>
    %c0_6 = arith.constant 0 : index
    %c0_7 = arith.constant 0 : index
    %10 = vector.load %arg4[%c0_6, %c0_7] : memref<128x64xbf16, #tpu.memory_space<vmem>>, vector<128x64xbf16>
    %cst_8 = arith.constant dense<0.000000e+00> : vector<160x64xf32>
    %11 = tpu.matmul %9, %10, %cst_8 {dimension_numbers = #tpu.dot_dimension_numbers<[1], [0], [0], [1], [0, 0, 1, 1], [], []>} : vector<160x128xbf16>, vector<128x64xbf16>, vector<160x64xf32> -> vector<160x64xf32>
    %c0_9 = arith.constant 0 : index
    %c0_10 = arith.constant 0 : index
    %12 = vector.load %arg5[%c0_9, %c0_10] : memref<1x64xf32, #tpu.memory_space<vmem>>, vector<1x64xf32>
    %13 = vector.broadcast %12 : vector<1x64xf32> to vector<160x64xf32>
    %14 = arith.addf %11, %13 : vector<160x64xf32>
    %cst_11 = arith.constant 0.000000e+00 : f32
    %15 = vector.broadcast %cst_11 : f32 to vector<160x64xf32>
    %16 = arith.maximumf %14, %15 : vector<160x64xf32>
    %17 = arith.truncf %16 : vector<160x64xf32> to vector<160x64xbf16>
    %c0_12 = arith.constant 0 : index
    %c0_13 = arith.constant 0 : index
    %18 = vector.load %arg6[%c0_12, %c0_13] : memref<64x128xbf16, #tpu.memory_space<vmem>>, vector<64x128xbf16>
    %cst_14 = arith.constant dense<0.000000e+00> : vector<160x128xf32>
    %19 = tpu.matmul %17, %18, %cst_14 {dimension_numbers = #tpu.dot_dimension_numbers<[1], [0], [0], [1], [0, 0, 1, 1], [], []>} : vector<160x64xbf16>, vector<64x128xbf16>, vector<160x128xf32> -> vector<160x128xf32>
    %c0_15 = arith.constant 0 : index
    %c0_16 = arith.constant 0 : index
    %20 = vector.load %arg7[%c0_15, %c0_16] : memref<1x128xf32, #tpu.memory_space<vmem>>, vector<1x128xf32>
    %21 = vector.broadcast %20 : vector<1x128xf32> to vector<160x128xf32>
    %22 = arith.addf %19, %21 : vector<160x128xf32>
    %23 = arith.truncf %22 : vector<160x128xf32> to vector<160x128xbf16>
    %c0_17 = arith.constant 0 : index
    %c0_18 = arith.constant 0 : index
    %24 = vector.load %arg8[%c0_17, %c0_18] : memref<160x128xbf16, #tpu.memory_space<vmem>>, vector<160x128xbf16>
    tpu.vector_store %arg8[%c0_17, %c0_18], %23 {strides = array<i32>} : memref<160x128xbf16, #tpu.memory_space<vmem>>, vector<160x128xbf16>,
    return
  }
  func.func @transform_0(%arg0: i32) -> (i32, i32) {
    %c0_i32 = arith.constant 0 : i32
    %c0_i32_0 = arith.constant 0 : i32
    return %arg0, %c0_i32 : i32, i32
  }
  func.func @transform_1(%arg0: i32) -> (i32, i32) {
    %c0_i32 = arith.constant 0 : i32
    %c0_i32_0 = arith.constant 0 : i32
    %c0_i32_1 = arith.constant 0 : i32
    return %c0_i32, %c0_i32_0 : i32, i32
  }
  func.func @transform_2(%arg0: i32) -> (i32, i32) {
    %c0_i32 = arith.constant 0 : i32
    %c0_i32_0 = arith.constant 0 : i32
    %c0_i32_1 = arith.constant 0 : i32
    return %c0_i32, %c0_i32_0 : i32, i32
  }
  func.func @transform_3(%arg0: i32) -> (i32, i32) {
    %c0_i32 = arith.constant 0 : i32
    %c0_i32_0 = arith.constant 0 : i32
    %c0_i32_1 = arith.constant 0 : i32
    return %c0_i32, %c0_i32_0 : i32, i32
  }
  func.func @transform_4(%arg0: i32) -> (i32, i32) {
    %c0_i32 = arith.constant 0 : i32
    %c0_i32_0 = arith.constant 0 : i32
    %c0_i32_1 = arith.constant 0 : i32
    return %c0_i32, %c0_i32_0 : i32, i32
  }
  func.func @transform_5(%arg0: i32) -> (i32, i32) {
    %c0_i32 = arith.constant 0 : i32
    %c0_i32_0 = arith.constant 0 : i32
    %c0_i32_1 = arith.constant 0 : i32
    return %c0_i32, %c0_i32_0 : i32, i32
  }
  func.func @transform_6(%arg0: i32) -> (i32, i32) {
    %c0_i32 = arith.constant 0 : i32
    %c0_i32_0 = arith.constant 0 : i32
    %c0_i32_1 = arith.constant 0 : i32
    return %c0_i32, %c0_i32_0 : i32, i32
  }
  func.func @transform_7(%arg0: i32) -> (i32, i32) {
    %c0_i32 = arith.constant 0 : i32
    %c0_i32_0 = arith.constant 0 : i32
    return %arg0, %c0_i32 : i32, i32
  }
}

</mosaic_0001>

<bundles_post_ra>
// kernel: mlp_forward.1
= control target key start
LH: loop header
LB: loop body
LE: loop exit
PB: predicated region body
PF: predicated region fallthrough
CT: control target
= control target key end

     0   :  { %s3078_s24 = smov 0   ;;  %s3080_s25 = smov 0   ;;  %s3696_s0 = inlined_call_operand.vmem [shape: f32[300,784], index: 0, kind: input, shape index: {}]   ;;  %s3697_s1 = inlined_call_operand.vmem [shape: bf16[784,128], index: 1, kind: input, shape index: {}]   ;;  %s3698_s2 = inlined_call_operand.vmem [shape: f32[1,128], index: 2, kind: input, shape index: {}]   ;;  %s3699_s3 = inlined_call_operand.vmem [shape: bf16[128,64], index: 3, kind: input, shape index: {}]   ;;  %s3700_s4 = inlined_call_operand.vmem [shape: f32[1,64], index: 4, kind: input, shape index: {}]   ;;  %s3701_s5 = inlined_call_operand.vmem [shape: bf16[64,128], index: 5, kind: input, shape index: {}]   ;;  %s3702_s6 = inlined_call_operand.vmem [shape: f32[1,128], index: 6, kind: input, shape index: {}]   ;;  %s3703_s7 = inlined_call_operand.vmem [shape: bf16[300,128], index: 7, kind: output, shape index: {}]  }
   0x1   :  { %s3082_s26 = smov 0  }
   0x2 LB: > { %s3091_s27 = sadd.s32 4294967295, %s3004_s26   ;;  %s3093_s28 = sadd.s32 1, %s3004_s26   ;;  %s3004_s26 = sphi %s3082_s26, %s3710_s26   ;;  %s3000_s25 = sphi %s3080_s25, %s3709_s25   ;;  %s2996_s24 = sphi %s3078_s24, %s3708_s24  }
   0x3   : > { %s173_s29 = ssub.s32 %s3004_s26, %s3093_s28  ;;  %s176_s30 = sadd.s32 1, %s3000_s25 }
   0x4   : > { %p174_p0 = scmp.eq.s32.totalorder %s173_s29, 0  ;;  %p186_p1 = scmp.ne.s32.totalorder %s3000_s25, %s2996_s24 }
   0x5   : > { %p187_p2 = scmp.eq.s32.totalorder %s3091_s27, 1  ;;  %p2223_p3 = scmp.ge.s32.totalorder %s3004_s26, 1 }
   0x6   : > { %s3101_s8 = scalar_select %p174_p0, %s3000_s25, %s176_s30  }
   0x7   : > { %p3103_p4 = por %p187_p2, %p186_p1  ;;  %p249_p5 = scmp.lt.s32.totalorder %s3004_s26, 3 }
   0x9   : > { %p250_p6 = pnand %p2223_p3, %p249_p5 }
   0xa   : > { %v2885_v0 = vld [vmem:[%s3697_s1 + $0x40] sm:$0xff] (!%p250_p6)   ;;  %v2889_v4 = vld [vmem:[%s3697_s1 + $0x48] sm:$0xff] (!%p250_p6)   ;;  %v2893_v8 = vld [vmem:[%s3697_s1 + $0x50] sm:$0xff] (!%p250_p6)   ;;  %s3150_s21 = smul.u32 (!%p250_p6), 20, %s3091_s27  ;;  %vm918_vm0 = vcmask (!%p250_p6), 130048   ;;  %vm1684_vm1 = vcmask (!%p250_p6), 523264  }
   0xb   : > { %253 = sbr.rel (%p250_p6) target bundleno = 930 (0x3a2), region = 48  ;;  %v2886_v1 = vld [vmem:[%s3697_s1 + $0xc0] sm:$0xff] (!%p250_p6)   ;;  %2421 = vmatprep.subr.bf16.mxu0 (!%p250_p6), %v2885_v0  ;;  %v2890_v5 = vld [vmem:[%s3697_s1 + $0xc8] sm:$0xff] (!%p250_p6)   ;;  %v2894_v9 = vld [vmem:[%s3697_s1 + $0xd0] sm:$0xff] (!%p250_p6)  }
   0xc   : > { %v2887_v2 = vld [vmem:[%s3697_s1] sm:$0xff] (!%p250_p6)   ;;  %2497 = vmatprep.subr.bf16.mxu1 (!%p250_p6), %v2886_v1  ;;  %v2891_v6 = vld [vmem:[%s3697_s1 + $0x8] sm:$0xff] (!%p250_p6)   ;;  %v2895_v10 = vld [vmem:[%s3697_s1 + $0x10] sm:$0xff] (!%p250_p6)   ;;  %p292_p7 = scmp.lt.s32.totalorder (!%p250_p6), %s3150_s21, 37 }
   0xd   : > { %v2888_v3 = vld [vmem:[%s3697_s1 + $0x80] sm:$0xff] (!%p250_p6)   ;;  %2422 = vmatpush3.bf16.msra.mxu0 (!%p250_p6), %v2887_v2  ;;  %v2892_v7 = vld [vmem:[%s3697_s1 + $0x88] sm:$0xff] (!%p250_p6)   ;;  %v2896_v11 = vld [vmem:[%s3697_s1 + $0x90] sm:$0xff] (!%p250_p6)  }
   0xe   : > { %2498 = vmatpush3.bf16.msra.mxu1 (!%p250_p6), %v2888_v3  ;;  %2423 = vmatprep.subr.bf16.mxu0 (!%p250_p6), %v2889_v4  ;;  %v2897_v12 = vld [vmem:[%s3697_s1 + $0x58] sm:$0xff] (!%p250_p6)   ;;  %v2901_v16 = vld [vmem:[%s3697_s1 + $0x60] sm:$0xff] (!%p250_p6)   ;;  %v2905_v20 = vld [vmem:[%s3697_s1 + $0x68] sm:$0xff] (!%p250_p6)  }
   0xf   : > { %2499 = vmatprep.subr.bf16.mxu1 (!%p250_p6), %v2890_v5  ;;  %v2898_v13 = vld [vmem:[%s3697_s1 + $0xd8] sm:$0xff] (!%p250_p6)   ;;  %v2902_v17 = vld [vmem:[%s3697_s1 + $0xe0] sm:$0xff] (!%p250_p6)   ;;  %v2906_v21 = vld [vmem:[%s3697_s1 + $0xe8] sm:$0xff] (!%p250_p6)  }
  0x10   : > { %v2899_v14 = vld [vmem:[%s3697_s1 + $0x18] sm:$0xff] (!%p250_p6)   ;;  %v2903_v18 = vld [vmem:[%s3697_s1 + $0x20] sm:$0xff] (!%p250_p6)   ;;  %v2907_v22 = vld [vmem:[%s3697_s1 + $0x28] sm:$0xff] (!%p250_p6)  }
  0x11   : > { %2424 = vmatpush3.bf16.msra.mxu0 (!%p250_p6), %v2891_v6  ;;  %v2900_v15 = vld [vmem:[%s3697_s1 + $0x98] sm:$0xff] (!%p250_p6)   ;;  %v2904_v19 = vld [vmem:[%s3697_s1 + $0xa0] sm:$0xff] (!%p250_p6)   ;;  %v2908_v23 = vld [vmem:[%s3697_s1 + $0xa8] sm:$0xff] (!%p250_p6)  }
  0x12   : > { %2500 = vmatpush3.bf16.msra.mxu1 %v2892_v7  ;;  %2425 = vmatprep.subr.bf16.mxu0 %v2893_v8  ;;  %s293_s22 = scalar_select %p292_p7, %s3150_s21, 37  ;;  %v2909_v24 = vld [vmem:[%s3697_s1 + $0x70] sm:$0xff]   ;;  %v2913_v28 = vld [vmem:[%s3697_s1 + $0x78] sm:$0xff]   ;;  %v2917_v44 = vld [vmem:[%s3697_s1 + $0x140] sm:$0xff]  }
  0x13   : > { %2501 = vmatprep.subr.bf16.mxu1 %v2894_v9  ;;  %v2910_v25 = vld [vmem:[%s3697_s1 + $0xf0] sm:$0xff]   ;;  %v2914_v29 = vld [vmem:[%s3697_s1 + $0xf8] sm:$0xff]   ;;  %v2918_v45 = vld [vmem:[%s3697_s1 + $0x100] sm:$0xff]   ;;  %s2361_s19 = smul.u32 (%p3103_p4), 80, %s3091_s27 }
  0x14   : > { %s2795_s14 = smul.u32 56, %s293_s22  ;;  %v2911_v26 = vld [vmem:[%s3697_s1 + $0x30] sm:$0xff]   ;;  %v2915_v30 = vld [vmem:[%s3697_s1 + $0x38] sm:$0xff]   ;;  %v2919_v57 = vld [vmem:[%s3697_s1 + $0x148] sm:$0xff]  }
  0x15   : > { %2426 = vmatpush3.bf16.msra.mxu0 %v2895_v10  ;;  %v2912_v27 = vld [vmem:[%s3697_s1 + $0xb0] sm:$0xff]   ;;  %v2916_v31 = vld [vmem:[%s3697_s1 + $0xb8] sm:$0xff]   ;;  %v2920_v59 = vld [vmem:[%s3697_s1 + $0x108] sm:$0xff]   ;;  %s3597_s26 = scalar_lea.vmem (%p3103_p4), %s3703_s7, %s2361_s19  }
  0x16   : > { %2502 = vmatpush3.bf16.msra.mxu1 %v2896_v11  ;;  %2427 = vmatprep.subr.bf16.mxu0 %v2897_v12  ;;  %s3205_s30 = scalar_lea.vmem %s3696_s0, %s2795_s14  ;;  %v2921_v5 = vld [vmem:[%s3697_s1 + $0x150] sm:$0xff]   ;;  %s283_s14 = sand.u32 1, %s2996_s24  }
  0x17   : > { %2503 = vmatprep.subr.bf16.mxu1 %v2898_v13  ;;  %v310_v32 = vld [vmem:[%s3205_s30 + $0x8] sm:$0xff]  ;;  %v317_v33 = vld [vmem:[%s3205_s30 + $0x40] sm:$0xff]  ;;  %v312_v34 = vld [vmem:[%s3205_s30 + $0x18] sm:$0xff]  ;;  %s2794_s17 = smul.u32 80, %s283_s14  ;;  %s1936_s24 = ssub.s32 (%p3103_p4), 38, %s3150_s21 }
  0x18   : > { %v450_v35 = vpack.c.bf16 %v317_v33, %v310_v32  ;;  %v319_v36 = vld [vmem:[%s3205_s30 + $0x50] sm:$0xff]  ;;  %v309_v37 = vld [vmem:[%s3205_s30] sm:$0xff]  ;;  %v316_v38 = vld [vmem:[%s3205_s30 + $0x38] sm:$0xff]  ;;  %p1937_p8 = scmp.lt.s32.totalorder (%p3103_p4), %s1936_s24, 20 }
  0x19   : > { %2428 = vmatpush3.bf16.msra.mxu0 %v2899_v14  ;;  %v452_v39 = vpack.c.bf16 %v319_v36, %v312_v34  ;;  %v449_v40 = vpack.c.bf16 %v316_v38, %v309_v37  ;;  %v311_v41 = vld [vmem:[%s3205_s30 + $0x10] sm:$0xff]  ;;  %v318_v42 = vld [vmem:[%s3205_s30 + $0x48] sm:$0xff]  ;;  %v324_v46 = vld [vmem:[%s3205_s30 + $0x78] sm:$0xff]  ;;  %s3578_s18 = scalar_lea.vmem [#allocation2], %s2794_s17  }
  0x1a   : > { %2504 = vmatpush3.bf16.msra.mxu1 %v2900_v15  ;;  %2429 = vmatprep.subr.bf16.mxu0 %v2901_v16  ;;  %v451_v43 = vpack.c.bf16 %v318_v42, %v311_v41  ;;  %v331_v47 = vld [vmem:[%s3205_s30 + $0xb0] sm:$0xff]  ;;  %v326_v48 = vld [vmem:[%s3205_s30 + $0x88] sm:$0xff]  ;;  %v333_v49 = vld [vmem:[%s3205_s30 + $0xc0] sm:$0xff] }
  0x1b   : > { %2505 = vmatprep.subr.bf16.mxu1 %v2902_v17  ;;  %981 = vmatprep.mubr.bf16.mxu0 %v450_v35  ;;  %v457_v50 = vpack.c.bf16 %v331_v47, %v324_v46  ;;  %v459_v51 = vpack.c.bf16 %v333_v49, %v326_v48  ;;  %v323_v52 = vld [vmem:[%s3205_s30 + $0x70] sm:$0xff]  ;;  %v330_v53 = vld [vmem:[%s3205_s30 + $0xa8] sm:$0xff]  ;;  %v325_v54 = vld [vmem:[%s3205_s30 + $0x80] sm:$0xff] }
  0x1c   : > { %1094 = vmatprep.mubr.bf16.mxu1 %v452_v39  ;;  %v332_v55 = vld [vmem:[%s3205_s30 + $0xb8] sm:$0xff]  ;;  %v456_v56 = vpack.c.bf16 %v330_v53, %v323_v52  ;;  %v338_v60 = vld [vmem:[%s3205_s30 + $0xe8] sm:$0xff]  ;;  %v345_v61 = vld [vmem:[%s3205_s30 + $0x120] sm:$0xff] }
  0x1d   : > { %2430 = vmatpush3.bf16.msra.mxu0 %v2903_v18  ;;  %v458_v58 = vpack.c.bf16 %v332_v55, %v325_v54  ;;  %v464_v62 = vpack.c.bf16 %v345_v61, %v338_v60  ;;  %v340_v63 = vld [vmem:[%s3205_s30 + $0xf8] sm:$0xff]  ;;  %v347_v0 = vld [vmem:[%s3205_s30 + $0x130] sm:$0xff]  ;;  %v337_v2 = vld [vmem:[%s3205_s30 + $0xe0] sm:$0xff] }
  0x1e   : > { %2506 = vmatpush3.bf16.msra.mxu1 %v2904_v19  ;;  %2431 = vmatprep.subr.bf16.mxu0 %v2905_v20  ;;  %v466_v1 = vpack.c.bf16 %v347_v0, %v340_v63  ;;  %v344_v3 = vld [vmem:[%s3205_s30 + $0x118] sm:$0xff]  ;;  %v339_v4 = vld [vmem:[%s3205_s30 + $0xf0] sm:$0xff]  ;;  %v346_v7 = vld [vmem:[%s3205_s30 + $0x128] sm:$0xff] }
  0x1f   : > { %2507 = vmatprep.subr.bf16.mxu1 %v2906_v21  ;;  %v2922_v6 = vld [vmem:[%s3697_s1 + $0x110] sm:$0xff]   ;;  %v352_v8 = vld [vmem:[%s3205_s30 + $0x158] sm:$0xff]  ;;  %v354_v10 = vld [vmem:[%s3205_s30 + $0x168] sm:$0xff]  ;;  %v463_v12 = vpack.c.bf16 %v344_v3, %v337_v2  ;;  %v465_v13 = vpack.c.bf16 %v346_v7, %v339_v4 }
  0x20   : > { %v359_v9 = vld [vmem:[%s3205_s30 + $0x190] sm:$0xff]  ;;  %v361_v11 = vld [vmem:[%s3205_s30 + $0x1a0] sm:$0xff]  ;;  %v2923_v15 = vld [vmem:[%s3697_s1 + $0x158] sm:$0xff]  }
  0x21   : > { %2432 = vmatpush3.bf16.msra.mxu0 %v2907_v22  ;;  %v471_v14 = vpack.c.bf16 %v359_v9, %v352_v8  ;;  %v473_v16 = vpack.c.bf16 %v361_v11, %v354_v10  ;;  %v2924_v17 = vld [vmem:[%s3697_s1 + $0x118] sm:$0xff]   ;;  %v351_v18 = vld [vmem:[%s3205_s30 + $0x150] sm:$0xff]  ;;  %v358_v19 = vld [vmem:[%s3205_s30 + $0x188] sm:$0xff] }
  0x22   : > { %2508 = vmatpush3.bf16.msra.mxu1 %v2908_v23  ;;  %2433 = vmatprep.subr.bf16.mxu0 %v2909_v24  ;;  %v353_v20 = vld [vmem:[%s3205_s30 + $0x160] sm:$0xff]  ;;  %v360_v21 = vld [vmem:[%s3205_s30 + $0x198] sm:$0xff]  ;;  %v366_v22 = vld [vmem:[%s3205_s30 + $0x1c8] sm:$0xff] }
  0x23   : > { %2509 = vmatprep.subr.bf16.mxu1 %v2910_v25  ;;  %v373_v23 = vld [vmem:[%s3205_s30 + $0x200] sm:$0xff]  ;;  %v368_v24 = vld [vmem:[%s3205_s30 + $0x1d8] sm:$0xff]  ;;  %v375_v25 = vld [vmem:[%s3205_s30 + $0x210] sm:$0xff] }
  0x24   : > { %v365_v32 = vld [vmem:[%s3205_s30 + $0x1c0] sm:$0xff]  ;;  %v372_v33 = vld [vmem:[%s3205_s30 + $0x1f8] sm:$0xff]  ;;  %v367_v34 = vld [vmem:[%s3205_s30 + $0x1d0] sm:$0xff] }
  0x25   : > { %2434 = vmatpush3.bf16.msra.mxu0 %v2911_v26  ;;  %v470_v26 = vpack.c.bf16 %v358_v19, %v351_v18  ;;  %v374_v35 = vld [vmem:[%s3205_s30 + $0x208] sm:$0xff]  ;;  %v380_v36 = vld [vmem:[%s3205_s30 + $0x238] sm:$0xff]  ;;  %v387_v38 = vld [vmem:[%s3205_s30 + $0x270] sm:$0xff]  ;;  %v477_v42 = vpack.c.bf16 %v372_v33, %v365_v32 }
  0x26   : > { %2510 = vmatpush3.bf16.msra.mxu1 %v2912_v27  ;;  %2435 = vmatprep.subr.bf16.mxu0 %v2913_v28  ;;  %v2925_v27 = vld [vmem:[%s3697_s1 + $0x160] sm:$0xff]   ;;  %v472_v28 = vpack.c.bf16 %v360_v21, %v353_v20  ;;  %v2927_v37 = vld [vmem:[%s3697_s1 + $0x168] sm:$0xff]   ;;  %v2929_v46 = vld [vmem:[%s3697_s1 + $0x170] sm:$0xff]  }
  0x27   : > { %2511 = vmatprep.subr.bf16.mxu1 %v2914_v29  ;;  %v478_v29 = vpack.c.bf16 %v373_v23, %v366_v22  ;;  %v2928_v39 = vld [vmem:[%s3697_s1 + $0x128] sm:$0xff]   ;;  %v389_v41 = vld [vmem:[%s3205_s30 + $0x280] sm:$0xff]  ;;  %v2930_v47 = vld [vmem:[%s3697_s1 + $0x130] sm:$0xff]  }
  0x28   : > { %v379_v48 = vld [vmem:[%s3205_s30 + $0x230] sm:$0xff]  ;;  %v386_v49 = vld [vmem:[%s3205_s30 + $0x268] sm:$0xff]  ;;  %v401_v53 = vld [vmem:[%s3205_s30 + $0x2e0] sm:$0xff] }
  0x29   : > { %2436 = vmatpush3.bf16.msra.mxu0 %v2915_v30  ;;  %v2926_v30 = vld [vmem:[%s3697_s1 + $0x120] sm:$0xff]   ;;  %v394_v52 = vld [vmem:[%s3205_s30 + $0x2a8] sm:$0xff]  ;;  %v2931_v54 = vld [vmem:[%s3697_s1 + $0x178] sm:$0xff]  }
  0x2a   : > { %2512 = vmatpush3.bf16.msra.mxu1 %v2916_v31  ;;  %2573 = vmatprep.subr.bf16.mxu0 %v2917_v44  ;;  %v480_v31 = vpack.c.bf16 %v375_v25, %v368_v24  ;;  %v396_v55 = vld [vmem:[%s3205_s30 + $0x2b8] sm:$0xff]  ;;  %v395_v0 = vld [vmem:[%s3205_s30 + $0x2b0] sm:$0xff]  ;;  %v410_v4 = vld [vmem:[%s3205_s30 + $0x328] sm:$0xff] }
  0x2b   : > { %2778 = vmatprep.subr.bf16.mxu1 %v2917_v44  ;;  %v485_v44 = vpack.c.bf16 %v387_v38, %v380_v36  ;;  %v2932_v60 = vld [vmem:[%s3697_s1 + $0x138] sm:$0xff]   ;;  %v415_v3 = vld [vmem:[%s3205_s30 + $0x350] sm:$0xff]  ;;  %v3324_v7 = vld [vmem:[%s3697_s1 + $0x180] sm:$0xff]  }
  0x2c   : > { %982 = vmatmul.mubr.bf16.vlgmr.msra.gmra.mrb[0].mxu0 %v449_v40  ;;  %v382_v40 = vld [vmem:[%s3205_s30 + $0x248] sm:$0xff]  ;;  %v400_v63 = vld [vmem:[%s3205_s30 + $0x2d8] sm:$0xff]  ;;  %v407_v11 = vld [vmem:[%s3205_s30 + $0x310] sm:$0xff] }
  0x2d   : > { %1095 = vmatmul.mubr.bf16.vlgmr.msra.gmra.mrb[0].mxu1 %v451_v43  ;;  %2574 = vmatpush3.bf16.msra.mxu0 %v2918_v45  ;;  %v479_v43 = vpack.c.bf16 %v374_v35, %v367_v34  ;;  %v408_v2 = vld [vmem:[%s3205_s30 + $0x318] sm:$0xff]  ;;  %v431_v18 = vld [vmem:[%s3205_s30 + $0x3d0] sm:$0xff]  ;;  %v421_v23 = vld [vmem:[%s3205_s30 + $0x380] sm:$0xff] }
  0x2e   : > { %2786 = vmatpush3.bf16.msra.mxu1 %v2918_v45  ;;  %989 = vmatprep.mubr.bf16.mxu0 %v457_v50  ;;  %v487_v45 = vpack.c.bf16 %v389_v41, %v382_v40  ;;  %v381_v50 = vld [vmem:[%s3205_s30 + $0x240] sm:$0xff]  ;;  %v499_v9 = vpack.c.bf16 %v415_v3, %v408_v2  ;;  %v428_v24 = vld [vmem:[%s3205_s30 + $0x3b8] sm:$0xff]  ;;  %v423_v25 = vld [vmem:[%s3205_s30 + $0x390] sm:$0xff] }
  0x2f   : > { %1102 = vmatprep.mubr.bf16.mxu1 %v459_v51  ;;  %2575 = vmatprep.subr.bf16.mxu0 %v2919_v57  ;;  %v388_v51 = vld [vmem:[%s3205_s30 + $0x278] sm:$0xff]  ;;  %v435_v35 = vld [vmem:[%s3205_s30 + $0x3f0] sm:$0xff]  ;;  %v442_v36 = vld [vmem:[%s3205_s30 + $0x428] sm:$0xff] }
  0x30   : > { %2779 = vmatprep.subr.bf16.mxu1 %v2919_v57  ;;  %v484_v57 = vpack.c.bf16 %v386_v49, %v379_v48  ;;  %v444_v38 = vld [vmem:[%s3205_s30 + $0x438] sm:$0xff]  ;;  %v321_v40 = vld [vmem:[%s3205_s30 + $0x60] sm:$0xff]  ;;  %v426_v41 = vld [vmem:[%s3205_s30 + $0x3a8] sm:$0xff] }
  0x31   : > { %2576 = vmatpush3.bf16.msra.mxu0 %v2920_v59  ;;  %v320_v48 = vld [vmem:[%s3205_s30 + $0x58] sm:$0xff]  ;;  %v425_v49 = vld [vmem:[%s3205_s30 + $0x3a0] sm:$0xff]  ;;  %v322_v2 = vld [vmem:[%s3205_s30 + $0x68] sm:$0xff] }
  0x32   : > { %2787 = vmatpush3.bf16.msra.mxu1 %v2920_v59  ;;  %2577 = vmatprep.subr.bf16.mxu0 %v2921_v5  ;;  %v492_v59 = vpack.c.bf16 %v401_v53, %v394_v52  ;;  %v335_v52 = vld [vmem:[%s3205_s30 + $0xd0] sm:$0xff]  ;;  %v440_v53 = vld [vmem:[%s3205_s30 + $0x418] sm:$0xff] }
  0x33   : > { %2780 = vmatprep.subr.bf16.mxu1 %v2921_v5  ;;  %v417_v5 = vld [vmem:[%s3205_s30 + $0x360] sm:$0xff] }
  0x34   : > { %990 = vmatmul.mubr.bf16.gmra.mrb[4].mxu0 %v456_v56  ;;  %v403_v56 = vld [vmem:[%s3205_s30 + $0x2f0] sm:$0xff]  ;;  %v501_v10 = vpack.c.bf16 %v417_v5, %v410_v4 }
  0x35   : > { %1103 = vmatmul.mubr.bf16.gmra.mrb[4].mxu1 %v458_v58  ;;  %997 = vmatprep.mubr.bf16.mxu0 %v464_v62  ;;  %v486_v58 = vpack.c.bf16 %v388_v51, %v381_v50  ;;  %v494_v61 = vpack.c.bf16 %v403_v56, %v396_v55  ;;  %v393_v62 = vld [vmem:[%s3205_s30 + $0x2a0] sm:$0xff]  ;;  %v432_v50 = vld [vmem:[%s3205_s30 + $0x3d8] sm:$0xff] }
  0x36   : > { %1110 = vmatprep.mubr.bf16.mxu1 %v466_v1  ;;  %2578 = vmatpush3.bf16.msra.mxu0 %v2922_v6  ;;  %v402_v1 = vld [vmem:[%s3205_s30 + $0x2e8] sm:$0xff]  ;;  %v328_v51 = vld [vmem:[%s3205_s30 + $0x98] sm:$0xff]  ;;  %v509_v56 = vpack.c.bf16 %v432_v50, %v425_v49  ;;  %v427_v49 = vld [vmem:[%s3205_s30 + $0x3b0] sm:$0xff] }
  0x37   : > { %2788 = vmatpush3.bf16.msra.mxu1 %v2922_v6  ;;  %2579 = vmatprep.subr.bf16.mxu0 %v2923_v15  ;;  %v491_v6 = vpack.c.bf16 %v400_v63, %v393_v62  ;;  %v493_v8 = vpack.c.bf16 %v402_v1, %v395_v0  ;;  %v446_v62 = vld [vmem:[%s3205_s30 + $0x448] sm:$0xff]  ;;  %v349_v0 = vld [vmem:[%s3205_s30 + $0x140] sm:$0xff]  ;;  %v315_v1 = vld [vmem:[%s3205_s30 + $0x30] sm:$0xff] }
  0x38   : > { %2781 = vmatprep.subr.bf16.mxu1 %v2923_v15  ;;  %v422_v15 = vld [vmem:[%s3205_s30 + $0x388] sm:$0xff] }
  0x39   : > { %v342_v63 = vld [vmem:[%s3205_s30 + $0x108] sm:$0xff] }
  0x3a   : > { %2580 = vmatpush3.bf16.msra.mxu0 %v2924_v17  ;;  %v468_v5 = vpack.c.bf16 %v349_v0, %v342_v63  ;;  %v434_v50 = vld [vmem:[%s3205_s30 + $0x3e8] sm:$0xff]  ;;  %v411_v0 = vld [vmem:[%s3205_s30 + $0x330] sm:$0xff] }
  0x3b   : > { %2789 = vmatpush3.bf16.msra.mxu1 %v2924_v17  ;;  %2581 = vmatprep.subr.bf16.mxu0 %v2925_v27  ;;  %v424_v17 = vld [vmem:[%s3205_s30 + $0x398] sm:$0xff] }
  0x3c   : > { %998 = vmatmul.mubr.bf16.gmra.mrb[8].mxu0 %v463_v12  ;;  %2782 = vmatprep.subr.bf16.mxu1 %v2925_v27  ;;  %v414_v12 = vld [vmem:[%s3205_s30 + $0x348] sm:$0xff]  ;;  %v508_v22 = vpack.c.bf16 %v431_v18, %v424_v17  ;;  %v436_v27 = vld [vmem:[%s3205_s30 + $0x3f8] sm:$0xff] }
  0x3d   : > { %1111 = vmatmul.mubr.bf16.gmra.mrb[8].mxu1 %v465_v13  ;;  %1005 = vmatprep.mubr.bf16.mxu0 %v471_v14  ;;  %v409_v13 = vld [vmem:[%s3205_s30 + $0x320] sm:$0xff]  ;;  %v416_v14 = vld [vmem:[%s3205_s30 + $0x358] sm:$0xff]  ;;  %v498_v19 = vpack.c.bf16 %v414_v12, %v407_v11  ;;  %v363_v12 = vld [vmem:[%s3205_s30 + $0x1b0] sm:$0xff] }
  0x3e   : > { %1118 = vmatprep.mubr.bf16.mxu1 %v473_v16  ;;  %2582 = vmatpush3.bf16.msra.mxu0 %v2926_v30  ;;  %v429_v16 = vld [vmem:[%s3205_s30 + $0x3c0] sm:$0xff]  ;;  %v500_v20 = vpack.c.bf16 %v416_v14, %v409_v13  ;;  %v356_v11 = vld [vmem:[%s3205_s30 + $0x178] sm:$0xff]  ;;  %v343_v13 = vld [vmem:[%s3205_s30 + $0x110] sm:$0xff] }
  0x3f   : > { %2790 = vmatpush3.bf16.msra.mxu1 %v2926_v30  ;;  %2583 = vmatprep.subr.bf16.mxu0 %v2927_v37  ;;  %v506_v21 = vpack.c.bf16 %v429_v16, %v422_v15  ;;  %v445_v30 = vld [vmem:[%s3205_s30 + $0x440] sm:$0xff]  ;;  %v350_v14 = vld [vmem:[%s3205_s30 + $0x148] sm:$0xff]  ;;  %v475_v17 = vpack.c.bf16 %v363_v12, %v356_v11 }
  0x40   : > { %2783 = vmatprep.subr.bf16.mxu1 %v2927_v37  ;;  %v437_v37 = vld [vmem:[%s3205_s30 + $0x400] sm:$0xff]  ;;  %v469_v18 = vpack.c.bf16 %v350_v14, %v343_v13 }
  0x41   : > { %v3445_v12 = vld [vmem:[%s3698_s2] ss:$0 sm:$0xff] }
  0x42   : > { %2584 = vmatpush3.bf16.msra.mxu0 %v2928_v39 }
  0x43   : > { %2791 = vmatpush3.bf16.msra.mxu1 %v2928_v39  ;;  %2585 = vmatprep.subr.bf16.mxu0 %v2929_v46  ;;  %v314_v39 = vld [vmem:[%s3205_s30 + $0x28] sm:$0xff] }
  0x44   : > { %1006 = vmatmul.mubr.bf16.gmra.mrb[12].mxu0 %v470_v26  ;;  %2784 = vmatprep.subr.bf16.mxu1 %v2929_v46  ;;  %v430_v26 = vld [vmem:[%s3205_s30 + $0x3c8] sm:$0xff] }
  0x45   : > { %1119 = vmatmul.mubr.bf16.gmra.mrb[12].mxu1 %v472_v28  ;;  %1013 = vmatprep.mubr.bf16.mxu0 %v478_v29  ;;  %v443_v28 = vld [vmem:[%s3205_s30 + $0x430] sm:$0xff]  ;;  %v438_v29 = vld [vmem:[%s3205_s30 + $0x408] sm:$0xff]  ;;  %v507_v32 = vpack.c.bf16 %v430_v26, %v423_v25 }
  0x46   : > { %1126 = vmatprep.mubr.bf16.mxu1 %v480_v31  ;;  %2586 = vmatpush3.bf16.msra.mxu0 %v2930_v47  ;;  %v505_v31 = vpack.c.bf16 %v428_v24, %v421_v23  ;;  %v513_v33 = vpack.c.bf16 %v443_v28, %v436_v27  ;;  %v515_v34 = vpack.c.bf16 %v445_v30, %v438_v29  ;;  %v370_v23 = vld [vmem:[%s3205_s30 + $0x1e8] sm:$0xff]  ;;  %v377_v24 = vld [vmem:[%s3205_s30 + $0x220] sm:$0xff]  ;;  %v371_v25 = vld [vmem:[%s3205_s30 + $0x1f0] sm:$0xff] }
  0x47   : > { %2587 = vmatprep.subr.bf16.mxu0 %v2931_v54  ;;  %2792 = vmatpush3.bf16.msra.mxu1 %v2930_v47  ;;  %v313_v47 = vld [vmem:[%s3205_s30 + $0x20] sm:$0xff]  ;;  %v378_v26 = vld [vmem:[%s3205_s30 + $0x228] sm:$0xff]  ;;  %v482_v29 = vpack.c.bf16 %v377_v24, %v370_v23 }
  0x48   : > { %2785 = vmatprep.subr.bf16.mxu1 %v2931_v54  ;;  %v447_v54 = vld [vmem:[%s3205_s30 + $0x450] sm:$0xff]  ;;  %v453_v55 = vpack.c.bf16 %v320_v48, %v313_v47  ;;  %v483_v30 = vpack.c.bf16 %v378_v26, %v371_v25  ;;  %v398_v47 = vld [vmem:[%s3205_s30 + $0x2c8] sm:$0xff]  ;;  %v405_v48 = vld [vmem:[%s3205_s30 + $0x300] sm:$0xff] }
  0x4a   : > { %2588 = vmatpush3.bf16.msra.mxu0 %v2932_v60 }
  0x4b   : > { %2793 = vmatpush3.bf16.msra.mxu1 %v2932_v60  ;;  %v334_v60 = vld [vmem:[%s3205_s30 + $0xc8] sm:$0xff] }
  0x4c   : > { %1014 = vmatmul.mubr.bf16.gmra.mrb[16].mxu0 %v477_v42  ;;  %2692 = vmatprep.subr.bf16.mxu1 %v3324_v7  ;;  %v433_v42 = vld [vmem:[%s3205_s30 + $0x3e0] sm:$0xff] }
  0x4d   : > { %1127 = vmatmul.mubr.bf16.gmra.mrb[16].mxu1 %v479_v43  ;;  %1021 = vmatprep.mubr.bf16.mxu0 %v485_v44  ;;  %v512_v43 = vpack.c.bf16 %v442_v36, %v435_v35  ;;  %v514_v44 = vpack.c.bf16 %v444_v38, %v437_v37  ;;  %v510_v46 = vpack.c.bf16 %v433_v42, %v426_v41  ;;  %v384_v35 = vld [vmem:[%s3205_s30 + $0x258] sm:$0xff]  ;;  %v391_v36 = vld [vmem:[%s3205_s30 + $0x290] sm:$0xff]  ;;  %v406_v38 = vld [vmem:[%s3205_s30 + $0x308] sm:$0xff] }
  0x4e   : > { %1134 = vmatprep.mubr.bf16.mxu1 %v487_v45  ;;  %v454_v45 = vpack.c.bf16 %v321_v40, %v314_v39  ;;  %v399_v37 = vld [vmem:[%s3205_s30 + $0x2d0] sm:$0xff]  ;;  %v489_v41 = vpack.c.bf16 %v391_v36, %v384_v35 }
  0x4f   : > { %v497_v42 = vpack.c.bf16 %v406_v38, %v399_v37 }
  0x54   : > { %1022 = vmatmul.mubr.bf16.gmra.mrb[20].mxu0 %v484_v57  ;;  %v461_v57 = vpack.c.bf16 %v335_v52, %v328_v51 }
  0x55   : > { %1135 = vmatmul.mubr.bf16.gmra.mrb[20].mxu1 %v486_v58  ;;  %1029 = vmatprep.mubr.bf16.mxu0 %v492_v59  ;;  %v517_v58 = vpack.c.bf16 %v447_v54, %v440_v53  ;;  %v327_v59 = vld [vmem:[%s3205_s30 + $0x90] sm:$0xff]  ;;  %v496_v53 = vpack.c.bf16 %v405_v48, %v398_v47  ;;  %v511_v54 = vpack.c.bf16 %v434_v50, %v427_v49 }
  0x56   : > { %1142 = vmatprep.mubr.bf16.mxu1 %v494_v61  ;;  %v439_v61 = vld [vmem:[%s3205_s30 + $0x410] sm:$0xff]  ;;  %v460_v3 = vpack.c.bf16 %v334_v60, %v327_v59  ;;  %v412_v59 = vld [vmem:[%s3205_s30 + $0x338] sm:$0xff] }
  0x57   : > { %v516_v4 = vpack.c.bf16 %v446_v62, %v439_v61  ;;  %v419_v60 = vld [vmem:[%s3205_s30 + $0x370] sm:$0xff] }
  0x58   : > { %v503_v63 = vpack.c.bf16 %v419_v60, %v412_v59 }
  0x5c   : > { %1030 = vmatmul.mubr.bf16.gmra.mrb[24].mxu0 %v491_v6  ;;  %v455_v6 = vpack.c.bf16 %v322_v2, %v315_v1  ;;  %v418_v1 = vld [vmem:[%s3205_s30 + $0x368] sm:$0xff] }
  0x5d   : > { %1143 = vmatmul.mubr.bf16.gmra.mrb[24].mxu1 %v493_v8  ;;  %1037 = vmatprep.mubr.bf16.mxu0 %v499_v9  ;;  %v341_v8 = vld [vmem:[%s3205_s30 + $0x100] sm:$0xff]  ;;  %v502_v2 = vpack.c.bf16 %v418_v1, %v411_v0 }
  0x5e   : > { %1150 = vmatprep.mubr.bf16.mxu1 %v501_v10  ;;  %v329_v9 = vld [vmem:[%s3205_s30 + $0xa0] sm:$0xff]  ;;  %v336_v10 = vld [vmem:[%s3205_s30 + $0xd8] sm:$0xff] }
  0x5f   : > { %v462_v16 = vpack.c.bf16 %v336_v10, %v329_v9  ;;  %v2940_v9 = vld [vmem:[%s3699_s3 + $0x30] sm:$0xff]   ;;  %v2941_v10 = vld [vmem:[%s3699_s3 + $0x38] sm:$0xff]  }
  0x64   : > { %1038 = vmatmul.mubr.bf16.gmra.mrb[28].mxu0 %v498_v19  ;;  %v355_v19 = vld [vmem:[%s3205_s30 + $0x170] sm:$0xff] }
  0x65   : > { %1151 = vmatmul.mubr.bf16.gmra.mrb[28].mxu1 %v500_v20  ;;  %1045 = vmatprep.mubr.bf16.mxu0 %v506_v21  ;;  %v362_v20 = vld [vmem:[%s3205_s30 + $0x1a8] sm:$0xff]  ;;  %v357_v21 = vld [vmem:[%s3205_s30 + $0x180] sm:$0xff] }
  0x66   : > { %1158 = vmatprep.mubr.bf16.mxu1 %v508_v22  ;;  %v364_v22 = vld [vmem:[%s3205_s30 + $0x1b8] sm:$0xff]  ;;  %v474_v27 = vpack.c.bf16 %v362_v20, %v355_v19 }
  0x67   : > { %v476_v28 = vpack.c.bf16 %v364_v22, %v357_v21 }
  0x6c   : > { %1046 = vmatmul.mubr.bf16.gmra.mrb[32].mxu0 %v505_v31  ;;  %v369_v31 = vld [vmem:[%s3205_s30 + $0x1e0] sm:$0xff] }
  0x6d   : > { %1159 = vmatmul.mubr.bf16.gmra.mrb[32].mxu1 %v507_v32  ;;  %1053 = vmatprep.mubr.bf16.mxu0 %v513_v33  ;;  %v376_v32 = vld [vmem:[%s3205_s30 + $0x218] sm:$0xff]  ;;  %v385_v33 = vld [vmem:[%s3205_s30 + $0x260] sm:$0xff] }
  0x6e   : > { %1166 = vmatprep.mubr.bf16.mxu1 %v515_v34  ;;  %v392_v34 = vld [vmem:[%s3205_s30 + $0x298] sm:$0xff]  ;;  %v481_v39 = vpack.c.bf16 %v376_v32, %v369_v31 }
  0x6f   : > { %v490_v40 = vpack.c.bf16 %v392_v34, %v385_v33 }
  0x74   : > { %1054 = vmatmul.mubr.bf16.gmra.mrb[36].mxu0 %v512_v43  ;;  %v383_v43 = vld [vmem:[%s3205_s30 + $0x250] sm:$0xff] }
  0x75   : > { %1167 = vmatmul.mubr.bf16.gmra.mrb[36].mxu1 %v514_v44  ;;  %1207 = vmatprep.mubr.bf16.mxu0 %v454_v45  ;;  %v390_v44 = vld [vmem:[%s3205_s30 + $0x288] sm:$0xff]  ;;  %v413_v45 = vld [vmem:[%s3205_s30 + $0x340] sm:$0xff] }
  0x76   : > { %1271 = vmatprep.mubr.bf16.mxu1 %v510_v46  ;;  %v420_v46 = vld [vmem:[%s3205_s30 + $0x378] sm:$0xff]  ;;  %v488_v51 = vpack.c.bf16 %v390_v44, %v383_v43 }
  0x77   : > { %v504_v52 = vpack.c.bf16 %v420_v46, %v413_v45 }
  0x7c   : > { %1208 = vmatmul.mubr.bf16.vlgmr.msra.gmra.mrb[40].mxu0 %v453_v55  ;;  %v397_v55 = vld [vmem:[%s3205_s30 + $0x2c0] sm:$0xff] }
  0x7d   : > { %1272 = vmatmul.mubr.bf16.vlgmr.msra.gmra.mrb[40].mxu1 %v509_v56  ;;  %1215 = vmatprep.mubr.bf16.mxu0 %v461_v57  ;;  %v404_v56 = vld [vmem:[%s3205_s30 + $0x2f8] sm:$0xff]  ;;  %v441_v57 = vld [vmem:[%s3205_s30 + $0x420] sm:$0xff] }
  0x7e   : > { %1279 = vmatprep.mubr.bf16.mxu1 %v517_v58  ;;  %2693 = vmatpush3.bf16.msra.mxu1 %v3324_v7  ;;  %v348_v7 = vld [vmem:[%s3205_s30 + $0x138] sm:$0xff]  ;;  %v495_v61 = vpack.c.bf16 %v404_v56, %v397_v55 }
  0x7f   : > { %v467_v15 = vpack.c.bf16 %v348_v7, %v341_v8  ;;  %v448_v58 = vld [vmem:[%s3205_s30 + $0x458] sm:$0xff]  ;;  %v2938_v8 = vld [vmem:[%s3699_s3 + $0x20] sm:$0xff]   ;;  %v2939_v7 = vld [vmem:[%s3699_s3 + $0x28] sm:$0xff]  }
  0x80   : > { %v518_v62 = vpack.c.bf16 %v448_v58, %v441_v57 }
  0x84   : > { %1216 = vmatmul.mubr.bf16.gmra.mrb[44].mxu0 %v460_v3  ;;  %v2934_v3 = vld [vmem:[%s3699_s3] sm:$0xff]  }
  0x85   : > { %1280 = vmatmul.mubr.bf16.gmra.mrb[44].mxu1 %v516_v4  ;;  %1223 = vmatprep.mubr.bf16.mxu0 %v468_v5  ;;  %v2935_v4 = vld [vmem:[%s3699_s3 + $0x8] sm:$0xff]   ;;  %v2936_v5 = vld [vmem:[%s3699_s3 + $0x10] sm:$0xff]  }
  0x86   : > { %2694 = vmatprep.mubr.msk.bf16.mxu1 %vm918_vm0, %v455_v6  ;;  %2714 = vmatprep.subr.bf16.mxu1 %v2934_v3  ;;  %v2937_v6 = vld [vmem:[%s3699_s3 + $0x18] sm:$0xff]  }
  0x8c   : > { %1224 = vmatmul.mubr.bf16.gmra.mrb[48].mxu0 %v467_v15 }
  0x8d   : > { %2695 = vmatmul.mubr.msk.bf16.vlgmr.msra.gmra.mrb[48].mxu1 %vm918_vm0, %v462_v16  ;;  %1231 = vmatprep.mubr.bf16.mxu0 %v475_v17 }
  0x8e   : > { %2698 = vmatprep.mubr.msk.bf16.mxu1 %vm918_vm0, %v469_v18  ;;  %2715 = vmatpush3.bf16.msra.mxu1 %v2934_v3 }
  0x8f   : > { %2716 = vmatprep.subr.bf16.mxu1 %v2935_v4 }
  0x92   : > { %2717 = vmatpush3.bf16.msra.mxu1 %v2935_v4 }
  0x93   : > { %2718 = vmatprep.subr.bf16.mxu1 %v2936_v5 }
  0x94   : > { %1232 = vmatmul.mubr.bf16.gmra.mrb[52].mxu0 %v474_v27 }
  0x95   : > { %2699 = vmatmul.mubr.msk.bf16.gmra.mrb[52].mxu1 %vm918_vm0, %v476_v28  ;;  %1239 = vmatprep.mubr.bf16.mxu0 %v482_v29 }
  0x96   : > { %2702 = vmatprep.mubr.msk.bf16.mxu1 %vm918_vm0, %v483_v30  ;;  %2719 = vmatpush3.bf16.msra.mxu1 %v2936_v5 }
  0x97   : > { %2720 = vmatprep.subr.bf16.mxu1 %v2937_v6 }
  0x9a   : > { %2721 = vmatpush3.bf16.msra.mxu1 %v2937_v6 }
  0x9b   : > { %2722 = vmatprep.subr.bf16.mxu1 %v2938_v8 }
  0x9c   : > { %1240 = vmatmul.mubr.bf16.gmra.mrb[56].mxu0 %v481_v39 }
  0x9d   : > { %2703 = vmatmul.mubr.msk.bf16.gmra.mrb[56].mxu1 %vm918_vm0, %v490_v40  ;;  %1247 = vmatprep.mubr.bf16.mxu0 %v489_v41 }
  0x9e   : > { %2706 = vmatprep.mubr.msk.bf16.mxu1 %vm918_vm0, %v497_v42  ;;  %2723 = vmatpush3.bf16.msra.mxu1 %v2938_v8 }
  0x9f   : > { %2724 = vmatprep.subr.bf16.mxu1 %v2939_v7 }
  0xa2   : > { %2725 = vmatpush3.bf16.msra.mxu1 %v2939_v7 }
  0xa3   : > { %2726 = vmatprep.subr.bf16.mxu1 %v2940_v9 }
  0xa4   : > { %1248 = vmatmul.mubr.bf16.gmra.mrb[60].mxu0 %v488_v51 }
  0xa5   : > { %2707 = vmatmul.mubr.msk.bf16.gmra.mrb[60].mxu1 %vm918_vm0, %v504_v52  ;;  %1255 = vmatprep.mubr.bf16.mxu0 %v496_v53 }
  0xa6   : > { %2710 = vmatprep.mubr.msk.bf16.mxu1 %vm918_vm0, %v511_v54  ;;  %2727 = vmatpush3.bf16.msra.mxu1 %v2940_v9 }
  0xa7   : > { %2728 = vmatprep.subr.bf16.mxu1 %v2941_v10 }
  0xaa   : > { %2729 = vmatpush3.bf16.msra.mxu1 %v2941_v10 }
  0xac   : > { %1256 = vmatmul.mubr.bf16.gmra.mrb[64].mxu0 %v495_v61 }
  0xad   : > { %2711 = vmatmul.mubr.msk.bf16.gmra.mrb[64].mxu1 %vm918_vm0, %v518_v62  ;;  %1263 = vmatprep.mubr.bf16.mxu0 %v503_v63 }
  0xb4   : > { %1264 = vmatmul.mubr.bf16.gmra.mrb[68].mxu0 %v502_v2 }
  0xff   : > { %v2437_v11 = vpop.f32.mrb[0].mxu0 }
 0x100   : > { %v2438_v13 = vpop.f32.mrb[1].mxu0  ;;  %v2513_v14 = vpop.f32.mrb[0].mxu1 }
 0x101   : > { %v2439_v15 = vadd.f32 %v2438_v13, %v2437_v11  ;;  %v2440_v16 = vpop.f32.mrb[2].mxu0  ;;  %v2514_v17 = vpop.f32.mrb[1].mxu1  ;;  %v2942_v11 = vld [vmem:[%s3701_s5] sm:$0xff]   ;;  %v2943_v13 = vld [vmem:[%s3701_s5 + $0x8] sm:$0xff]  }
 0x102   : > { %v2441_v18 = vpop.f32.mrb[3].mxu0  ;;  %v2515_v19 = vadd.f32 %v2514_v17, %v2513_v14  ;;  %v2516_v20 = vpop.f32.mrb[2].mxu1  ;;  %2750 = vmatprep.subr.bf16.mxu0 %v2942_v11 }
 0x103   : > { %v984_v21 = vadd.f32 %v2439_v15, %v3445_v12  ;;  %v2442_v22 = vadd.f32 %v2441_v18, %v2440_v16  ;;  %v2517_v23 = vpop.f32.mrb[3].mxu1  ;;  %2751 = vmatpush3.bf16.msra.mxu0 %v2942_v11 }
 0x104   : > { %v2518_v24 = vadd.f32 %v2517_v23, %v2516_v20  ;;  %2752 = vmatprep.subr.bf16.mxu0 %v2943_v13 }
 0x105   : > { %v987_v25 = vadd.f32 %v2442_v22, %v3445_v12  ;;  %v3449_v26 = vadd.f32 %v2515_v19, %v984_v21  ;;  %v2944_v21 = vld [vmem:[%s3701_s5 + $0x10] sm:$0xff]  }
 0x107   : > { %v3451_v27 = vadd.f32 %v2518_v24, %v987_v25  ;;  %v2443_v28 = vpop.f32.mrb[4].mxu0  ;;  %2753 = vmatpush3.bf16.msra.mxu0 %v2943_v13 }
 0x108   : > { %v2444_v29 = vpop.f32.mrb[5].mxu0  ;;  %v2519_v30 = vpop.f32.mrb[4].mxu1  ;;  %2754 = vmatprep.subr.bf16.mxu0 %v2944_v21 }
 0x109   : > { %v2445_v31 = vadd.f32 %v2444_v29, %v2443_v28  ;;  %v2446_v32 = vpop.f32.mrb[6].mxu0  ;;  %v2520_v33 = vpop.f32.mrb[5].mxu1 }
 0x10a   : > { %v2447_v34 = vpop.f32.mrb[7].mxu0  ;;  %v2521_v35 = vadd.f32 %v2520_v33, %v2519_v30  ;;  %v2522_v36 = vpop.f32.mrb[6].mxu1 }
 0x10b   : > { %v992_v37 = vadd.f32 %v2445_v31, %v3445_v12  ;;  %v2448_v38 = vadd.f32 %v2447_v34, %v2446_v32  ;;  %v2523_v39 = vpop.f32.mrb[7].mxu1  ;;  %2755 = vmatpush3.bf16.msra.mxu0 %v2944_v21 }
 0x10c   : > { %v2524_v40 = vadd.f32 %v2523_v39, %v2522_v36 }
 0x10d   : > { %v995_v41 = vadd.f32 %v2448_v38, %v3445_v12  ;;  %v3455_v42 = vadd.f32 %v2521_v35, %v992_v37 }
 0x10f   : > { %v3457_v43 = vadd.f32 %v2524_v40, %v995_v41  ;;  %v2449_v44 = vpop.f32.mrb[8].mxu0 }
 0x110   : > { %v2450_v45 = vpop.f32.mrb[9].mxu0  ;;  %v2525_v46 = vpop.f32.mrb[8].mxu1 }
 0x111   : > { %v2451_v47 = vadd.f32 %v2450_v45, %v2449_v44  ;;  %v2452_v48 = vpop.f32.mrb[10].mxu0  ;;  %v2526_v49 = vpop.f32.mrb[9].mxu1 }
 0x112   : > { %v2453_v50 = vpop.f32.mrb[11].mxu0  ;;  %v2527_v51 = vadd.f32 %v2526_v49, %v2525_v46  ;;  %v2528_v52 = vpop.f32.mrb[10].mxu1 }
 0x113   : > { %v1000_v53 = vadd.f32 %v2451_v47, %v3445_v12  ;;  %v2454_v54 = vadd.f32 %v2453_v50, %v2452_v48  ;;  %v2529_v55 = vpop.f32.mrb[11].mxu1 }
 0x114   : > { %v2530_v56 = vadd.f32 %v2529_v55, %v2528_v52 }
 0x115   : > { %v1003_v57 = vadd.f32 %v2454_v54, %v3445_v12  ;;  %v3461_v58 = vadd.f32 %v2527_v51, %v1000_v53 }
 0x117   : > { %v3463_v59 = vadd.f32 %v2530_v56, %v1003_v57  ;;  %v2455_v60 = vpop.f32.mrb[12].mxu0 }
 0x118   : > { %v2456_v61 = vpop.f32.mrb[13].mxu0  ;;  %v2531_v62 = vpop.f32.mrb[12].mxu1 }
 0x119   : > { %v2457_v63 = vadd.f32 %v2456_v61, %v2455_v60  ;;  %v2458_v0 = vpop.f32.mrb[14].mxu0  ;;  %v2532_v1 = vpop.f32.mrb[13].mxu1 }
 0x11a   : > { %v2459_v2 = vpop.f32.mrb[15].mxu0  ;;  %v2533_v3 = vadd.f32 %v2532_v1, %v2531_v62  ;;  %v2534_v4 = vpop.f32.mrb[14].mxu1 }
 0x11b   : > { %v1008_v5 = vadd.f32 %v2457_v63, %v3445_v12  ;;  %v2460_v6 = vadd.f32 %v2459_v2, %v2458_v0  ;;  %v2535_v8 = vpop.f32.mrb[15].mxu1 }
 0x11c   : > { %v2536_v7 = vadd.f32 %v2535_v8, %v2534_v4 }
 0x11d   : > { %v1011_v9 = vadd.f32 %v2460_v6, %v3445_v12  ;;  %v3467_v10 = vadd.f32 %v2533_v3, %v1008_v5 }
 0x11f   : > { %v3475_v14 = vadd.f32 %v2536_v7, %v1011_v9  ;;  %v2461_v15 = vpop.f32.mrb[16].mxu0 }
 0x120   : > { %v2462_v16 = vpop.f32.mrb[17].mxu0  ;;  %v2537_v17 = vpop.f32.mrb[16].mxu1 }
 0x121   : > { %v2463_v18 = vadd.f32 %v2462_v16, %v2461_v15  ;;  %v2464_v19 = vpop.f32.mrb[18].mxu0  ;;  %v2538_v20 = vpop.f32.mrb[17].mxu1 }
 0x122   : > { %v2465_v22 = vpop.f32.mrb[19].mxu0  ;;  %v2539_v23 = vadd.f32 %v2538_v20, %v2537_v17  ;;  %v2540_v24 = vpop.f32.mrb[18].mxu1 }
 0x123   : > { %v1016_v25 = vadd.f32 %v2463_v18, %v3445_v12  ;;  %v2466_v28 = vadd.f32 %v2465_v22, %v2464_v19  ;;  %v2541_v29 = vpop.f32.mrb[19].mxu1 }
 0x124   : > { %v2542_v30 = vadd.f32 %v2541_v29, %v2540_v24 }
 0x125   : > { %v1019_v31 = vadd.f32 %v2466_v28, %v3445_v12  ;;  %v3482_v32 = vadd.f32 %v2539_v23, %v1016_v25 }
 0x127   : > { %v3484_v33 = vadd.f32 %v2542_v30, %v1019_v31  ;;  %v2467_v34 = vpop.f32.mrb[20].mxu0 }
 0x128   : > { %v2468_v35 = vpop.f32.mrb[21].mxu0  ;;  %v2543_v36 = vpop.f32.mrb[20].mxu1 }
 0x129   : > { %v2469_v37 = vadd.f32 %v2468_v35, %v2467_v34  ;;  %v2470_v38 = vpop.f32.mrb[22].mxu0  ;;  %v2544_v39 = vpop.f32.mrb[21].mxu1 }
 0x12a   : > { %v2471_v40 = vpop.f32.mrb[23].mxu0  ;;  %v2545_v41 = vadd.f32 %v2544_v39, %v2543_v36  ;;  %v2546_v44 = vpop.f32.mrb[22].mxu1 }
 0x12b   : > { %v1024_v45 = vadd.f32 %v2469_v37, %v3445_v12  ;;  %v2472_v46 = vadd.f32 %v2471_v40, %v2470_v38  ;;  %v2547_v47 = vpop.f32.mrb[23].mxu1 }
 0x12c   : > { %v2548_v48 = vadd.f32 %v2547_v47, %v2546_v44 }
 0x12d   : > { %v1027_v49 = vadd.f32 %v2472_v46, %v3445_v12  ;;  %v3488_v50 = vadd.f32 %v2545_v41, %v1024_v45 }
 0x12f   : > { %v3490_v51 = vadd.f32 %v2548_v48, %v1027_v49  ;;  %v2473_v52 = vpop.f32.mrb[24].mxu0 }
 0x130   : > { %v2474_v53 = vpop.f32.mrb[25].mxu0  ;;  %v2549_v54 = vpop.f32.mrb[24].mxu1 }
 0x131   : > { %v2475_v55 = vadd.f32 %v2474_v53, %v2473_v52  ;;  %v2476_v56 = vpop.f32.mrb[26].mxu0  ;;  %v2550_v57 = vpop.f32.mrb[25].mxu1 }
 0x132   : > { %v2477_v60 = vpop.f32.mrb[27].mxu0  ;;  %v2551_v61 = vadd.f32 %v2550_v57, %v2549_v54  ;;  %v2552_v62 = vpop.f32.mrb[26].mxu1 }
 0x133   : > { %v1032_v63 = vadd.f32 %v2475_v55, %v3445_v12  ;;  %v2478_v0 = vadd.f32 %v2477_v60, %v2476_v56  ;;  %v2553_v1 = vpop.f32.mrb[27].mxu1 }
 0x134   : > { %v2554_v2 = vadd.f32 %v2553_v1, %v2552_v62 }
 0x135   : > { %v1035_v3 = vadd.f32 %v2478_v0, %v3445_v12  ;;  %v3494_v4 = vadd.f32 %v2551_v61, %v1032_v63 }
 0x137   : > { %v3496_v5 = vadd.f32 %v2554_v2, %v1035_v3  ;;  %v2479_v6 = vpop.f32.mrb[28].mxu0 }
 0x138   : > { %v2480_v8 = vpop.f32.mrb[29].mxu0  ;;  %v2555_v7 = vpop.f32.mrb[28].mxu1 }
 0x139   : > { %v2481_v9 = vadd.f32 %v2480_v8, %v2479_v6  ;;  %v2482_v11 = vpop.f32.mrb[30].mxu0  ;;  %v2556_v13 = vpop.f32.mrb[29].mxu1 }
 0x13a   : > { %v2483_v15 = vpop.f32.mrb[31].mxu0  ;;  %v2557_v16 = vadd.f32 %v2556_v13, %v2555_v7  ;;  %v2558_v17 = vpop.f32.mrb[30].mxu1 }
 0x13b   : > { %v1040_v18 = vadd.f32 %v2481_v9, %v3445_v12  ;;  %v2484_v19 = vadd.f32 %v2483_v15, %v2482_v11  ;;  %v2559_v20 = vpop.f32.mrb[31].mxu1 }
 0x13c   : > { %v2560_v21 = vadd.f32 %v2559_v20, %v2558_v17 }
 0x13d   : > { %v1043_v22 = vadd.f32 %v2484_v19, %v3445_v12  ;;  %v3500_v23 = vadd.f32 %v2557_v16, %v1040_v18 }
 0x13f   : > { %v3502_v24 = vadd.f32 %v2560_v21, %v1043_v22  ;;  %v2485_v25 = vpop.f32.mrb[32].mxu0 }
 0x140   : > { %v2486_v28 = vpop.f32.mrb[33].mxu0  ;;  %v2561_v29 = vpop.f32.mrb[32].mxu1 }
 0x141   : > { %v2487_v30 = vadd.f32 %v2486_v28, %v2485_v25  ;;  %v2488_v31 = vpop.f32.mrb[34].mxu0  ;;  %v2562_v34 = vpop.f32.mrb[33].mxu1 }
 0x142   : > { %v2489_v35 = vpop.f32.mrb[35].mxu0  ;;  %v2563_v36 = vadd.f32 %v2562_v34, %v2561_v29  ;;  %v2564_v37 = vpop.f32.mrb[34].mxu1 }
 0x143   : > { %v1048_v38 = vadd.f32 %v2487_v30, %v3445_v12  ;;  %v2490_v39 = vadd.f32 %v2489_v35, %v2488_v31  ;;  %v2565_v40 = vpop.f32.mrb[35].mxu1 }
 0x144   : > { %v2566_v41 = vadd.f32 %v2565_v40, %v2564_v37 }
 0x145   : > { %v1051_v44 = vadd.f32 %v2490_v39, %v3445_v12  ;;  %v1161_v45 = vadd.f32 %v2563_v36, %v1048_v38 }
 0x147   : > { %v1164_v46 = vadd.f32 %v2566_v41, %v1051_v44  ;;  %v2491_v47 = vpop.f32.mrb[36].mxu0 }
 0x148   : > { %v2492_v48 = vpop.f32.mrb[37].mxu0  ;;  %v2567_v49 = vpop.f32.mrb[36].mxu1 }
 0x149   : > { %v2493_v52 = vadd.f32 %v2492_v48, %v2491_v47  ;;  %v2494_v53 = vpop.f32.mrb[38].mxu0  ;;  %v2568_v54 = vpop.f32.mrb[37].mxu1 }
 0x14a   : > { %v2495_v55 = vpop.f32.mrb[39].mxu0  ;;  %v2569_v56 = vadd.f32 %v2568_v54, %v2567_v49  ;;  %v2570_v57 = vpop.f32.mrb[38].mxu1 }
 0x14b   : > { %v1056_v60 = vadd.f32 %v2493_v52, %v3445_v12  ;;  %v2496_v61 = vadd.f32 %v2495_v55, %v2494_v53  ;;  %v2571_v62 = vpop.f32.mrb[39].mxu1 }
 0x14c   : > { %v2572_v63 = vadd.f32 %v2571_v62, %v2570_v57 }
 0x14d   : > { %v1059_v0 = vadd.f32 %v2496_v61, %v3445_v12  ;;  %v1169_v1 = vadd.f32 %v2569_v56, %v1056_v60 }
 0x14f   : > { %v1172_v2 = vadd.f32 %v2572_v63, %v1059_v0  ;;  %v2589_v3 = vpop.f32.mrb[40].mxu0 }
 0x150   : > { %v2637_v6 = vpop.f32.mrb[40].mxu1  ;;  %v2590_v8 = vpop.f32.mrb[41].mxu0 }
 0x151   : > { %v2591_v7 = vadd.f32 %v2590_v8, %v2589_v3  ;;  %v2638_v9 = vpop.f32.mrb[41].mxu1  ;;  %v2592_v11 = vpop.f32.mrb[42].mxu0 }
 0x152   : > { %v2639_v13 = vadd.f32 %v2638_v9, %v2637_v6  ;;  %v2640_v15 = vpop.f32.mrb[42].mxu1  ;;  %v2593_v16 = vpop.f32.mrb[43].mxu0 }
 0x153   : > { %v2594_v17 = vadd.f32 %v2593_v16, %v2592_v11  ;;  %v2641_v18 = vpop.f32.mrb[43].mxu1  ;;  %v1210_v19 = vadd.f32 %v2591_v7, %v3449_v26 }
 0x154   : > { %v2642_v20 = vadd.f32 %v2641_v18, %v2640_v15  ;;  %v3509_v21 = vadd.f32 %v2639_v13, %v1161_v45 }
 0x155   : > { %v1213_v12 = vadd.f32 %v2594_v17, %v3451_v27 }
 0x156   : > { %v3512_v22 = vadd.f32 %v2642_v20, %v1164_v46 }
 0x157   : > { %v2595_v25 = vpop.f32.mrb[44].mxu0 }
 0x158   : > { %v2643_v28 = vpop.f32.mrb[44].mxu1  ;;  %v2596_v29 = vpop.f32.mrb[45].mxu0 }
 0x159   : > { %v2597_v30 = vadd.f32 %v2596_v29, %v2595_v25  ;;  %v2644_v31 = vpop.f32.mrb[45].mxu1  ;;  %v2598_v34 = vpop.f32.mrb[46].mxu0 }
 0x15a   : > { %v2645_v35 = vadd.f32 %v2644_v31, %v2643_v28  ;;  %v2646_v36 = vpop.f32.mrb[46].mxu1  ;;  %v2599_v37 = vpop.f32.mrb[47].mxu0 }
 0x15b   : > { %v2600_v38 = vadd.f32 %v2599_v37, %v2598_v34  ;;  %v2647_v39 = vpop.f32.mrb[47].mxu1  ;;  %v1218_v26 = vadd.f32 %v2597_v30, %v3455_v42 }
 0x15c   : > { %v2648_v40 = vadd.f32 %v2647_v39, %v2646_v36  ;;  %v3515_v41 = vadd.f32 %v2645_v35, %v1169_v1 }
 0x15d   : > { %v1221_v27 = vadd.f32 %v2600_v38, %v3457_v43 }
 0x15e   : > { %v3518_v44 = vadd.f32 %v2648_v40, %v1172_v2 }
 0x15f   : > { %v2601_v45 = vpop.f32.mrb[48].mxu0 }
 0x160   : > { %v2696_v46 = vpop.f32.mrb[48].mxu1  ;;  %v2602_v47 = vpop.f32.mrb[49].mxu0 }
 0x161   : > { %v1331_v48 = vadd.f32 %v2696_v46, %v1218_v26  ;;  %v2603_v49 = vadd.f32 %v2602_v47, %v2601_v45  ;;  %v1322_v52 = vpop.f32.mrb[49].mxu1  ;;  %v2604_v53 = vpop.f32.mrb[50].mxu0 }
 0x162   : > { %v1323_v54 = vadd.f32 %v1322_v52, %v1210_v19  ;;  %v2697_v55 = vpop.f32.mrb[50].mxu1  ;;  %v2605_v56 = vpop.f32.mrb[51].mxu0 }
 0x163   : > { %v1334_v57 = vadd.f32 %v2697_v55, %v1221_v27  ;;  %v2606_v60 = vadd.f32 %v2605_v56, %v2604_v53  ;;  %v1325_v42 = vpop.f32.mrb[51].mxu1  ;;  %v1226_v61 = vadd.f32 %v2603_v49, %v3461_v58  ;;  %v1403_v63 = vmax.f32 %v1331_v48, 0.0 }
 0x164   : > { %v1326_v62 = vadd.f32 %v1325_v42, %v1213_v12  ;;  %v1401_v1 = vmax.f32 %v1323_v54, 0.0 }
 0x165   : > { %v1404_v43 = vmax.f32 %v1334_v57, 0.0  ;;  %v1229_v0 = vadd.f32 %v2606_v60, %v3463_v59 }
 0x166   : > { %v1402_v2 = vmax.f32 %v1326_v62, 0.0 }
 0x167   : > { %v1422_v3 = vpack.c.bf16 %v1404_v43, %v1403_v63  ;;  %v2607_v6 = vpop.f32.mrb[52].mxu0 }
 0x168   : > { %v1421_v8 = vpack.c.bf16 %v1402_v2, %v1401_v1  ;;  %v2700_v7 = vpop.f32.mrb[52].mxu1  ;;  %v2608_v9 = vpop.f32.mrb[53].mxu0 }
 0x169   : > { %v2609_v11 = vadd.f32 %v2608_v9, %v2607_v6  ;;  %v1338_v13 = vpop.f32.mrb[53].mxu1  ;;  %v2610_v15 = vpop.f32.mrb[54].mxu0 }
 0x16a   : > { %v1339_v16 = vadd.f32 %v1338_v13, %v1226_v61  ;;  %v2701_v17 = vpop.f32.mrb[54].mxu1  ;;  %2730 = vmatprep.mubr.bf16.mxu1 %v1421_v8  ;;  %v2611_v18 = vpop.f32.mrb[55].mxu0 }
 0x16b   : > { %v1234_v58 = vadd.f32 %v2609_v11, %v3467_v10  ;;  %v2612_v19 = vadd.f32 %v2611_v18, %v2610_v15  ;;  %v1341_v20 = vpop.f32.mrb[55].mxu1  ;;  %2731 = vmatmul.mubr.bf16.vlgmr.msra.gmra.mrb[68].mxu1 %v1422_v3 }
 0x16c   : > { %v1342_v59 = vadd.f32 %v1341_v20, %v1229_v0  ;;  %v1405_v28 = vmax.f32 %v1339_v16, 0.0 }
 0x16d   : > { %v1347_v12 = vadd.f32 %v2700_v7, %v1234_v58  ;;  %v1237_v25 = vadd.f32 %v2612_v19, %v3475_v14 }
 0x16e   : > { %v1406_v29 = vmax.f32 %v1342_v59, 0.0 }
 0x16f   : > { %v1350_v30 = vadd.f32 %v2701_v17, %v1237_v25  ;;  %v2613_v31 = vpop.f32.mrb[56].mxu0  ;;  %v1407_v37 = vmax.f32 %v1347_v12, 0.0 }
 0x170   : > { %v1423_v34 = vpack.c.bf16 %v1406_v29, %v1405_v28  ;;  %v2614_v35 = vpop.f32.mrb[57].mxu0  ;;  %v2704_v36 = vpop.f32.mrb[56].mxu1 }
 0x171   : > { %v1408_v38 = vmax.f32 %v1350_v30, 0.0  ;;  %v2615_v39 = vadd.f32 %v2614_v35, %v2613_v31  ;;  %v2616_v26 = vpop.f32.mrb[58].mxu0  ;;  %v1354_v40 = vpop.f32.mrb[57].mxu1 }
 0x172   : > { %2734 = vmatprep.mubr.bf16.mxu1 %v1423_v34  ;;  %v2617_v10 = vpop.f32.mrb[59].mxu0  ;;  %v2705_v27 = vpop.f32.mrb[58].mxu1 }
 0x173   : > { %v2618_v45 = vadd.f32 %v2617_v10, %v2616_v26  ;;  %v1242_v46 = vadd.f32 %v2615_v39, %v3482_v32  ;;  %v1424_v47 = vpack.c.bf16 %v1408_v38, %v1407_v37  ;;  %v1357_v14 = vpop.f32.mrb[59].mxu1 }
 0x175   : > { %v1355_v48 = vadd.f32 %v1354_v40, %v1242_v46  ;;  %2735 = vmatmul.mubr.bf16.gmra.mrb[72].mxu1 %v1424_v47  ;;  %v1245_v49 = vadd.f32 %v2618_v45, %v3484_v33 }
 0x177   : > { %v1358_v52 = vadd.f32 %v1357_v14, %v1245_v49  ;;  %v2619_v53 = vpop.f32.mrb[60].mxu0  ;;  %v1409_v56 = vmax.f32 %v1355_v48, 0.0  ;;  %v2945_v49 = vld [vmem:[%s3701_s5 + $0x18] sm:$0xff]  }
 0x178   : > { %v2620_v54 = vpop.f32.mrb[61].mxu0  ;;  %v2708_v55 = vpop.f32.mrb[60].mxu1  ;;  %2756 = vmatprep.subr.bf16.mxu0 %v2945_v49 }
 0x179   : > { %v1410_v57 = vmax.f32 %v1358_v52, 0.0  ;;  %v2621_v60 = vadd.f32 %v2620_v54, %v2619_v53  ;;  %v2622_v42 = vpop.f32.mrb[62].mxu0  ;;  %v1370_v61 = vpop.f32.mrb[61].mxu1  ;;  %2757 = vmatpush3.bf16.msra.mxu0 %v2945_v49 }
 0x17a   : > { %v2623_v62 = vpop.f32.mrb[63].mxu0  ;;  %v2709_v63 = vpop.f32.mrb[62].mxu1 }
 0x17b   : > { %v1425_v43 = vpack.c.bf16 %v1410_v57, %v1409_v56  ;;  %v1250_v32 = vadd.f32 %v2621_v60, %v3488_v50  ;;  %v2624_v0 = vadd.f32 %v2623_v62, %v2622_v42  ;;  %v1373_v1 = vpop.f32.mrb[63].mxu1 }
 0x17d   : > { %v1363_v2 = vadd.f32 %v2704_v36, %v1250_v32  ;;  %v1253_v3 = vadd.f32 %v2624_v0, %v3490_v51  ;;  %2738 = vmatprep.mubr.bf16.mxu1 %v1425_v43 }
 0x17f   : > { %v1366_v33 = vadd.f32 %v2705_v27, %v1253_v3  ;;  %v2625_v6 = vpop.f32.mrb[64].mxu0  ;;  %v1411_v17 = vmax.f32 %v1363_v2, 0.0 }
 0x180   : > { %v2712_v8 = vpop.f32.mrb[64].mxu1  ;;  %v2626_v7 = vpop.f32.mrb[65].mxu0 }
 0x181   : > { %v1412_v9 = vmax.f32 %v1366_v33, 0.0  ;;  %v1395_v11 = vadd.f32 %v2712_v8, %v3515_v41  ;;  %v2627_v13 = vadd.f32 %v2626_v7, %v2625_v6  ;;  %v1386_v15 = vpop.f32.mrb[65].mxu1  ;;  %v2628_v16 = vpop.f32.mrb[66].mxu0 }
 0x182   : > { %v1387_v18 = vadd.f32 %v1386_v15, %v3509_v21  ;;  %v2713_v50 = vpop.f32.mrb[66].mxu1  ;;  %v2629_v58 = vpop.f32.mrb[67].mxu0 }
 0x183   : > { %v1258_v19 = vadd.f32 %v2627_v13, %v3494_v4  ;;  %v1398_v51 = vadd.f32 %v2713_v50, %v3518_v44  ;;  %v2630_v20 = vadd.f32 %v2629_v58, %v2628_v16  ;;  %v1389_v59 = vpop.f32.mrb[67].mxu1  ;;  %v1426_v25 = vpack.c.bf16 %v1412_v9, %v1411_v17 }
 0x184   : > { %v1390_v12 = vadd.f32 %v1389_v59, %v3512_v22  ;;  %v1419_v28 = vmax.f32 %v1395_v11, 0.0  ;;  %v1417_v31 = vmax.f32 %v1387_v18, 0.0 }
 0x185   : > { %v1371_v29 = vadd.f32 %v1370_v61, %v1258_v19  ;;  %v1420_v41 = vmax.f32 %v1398_v51, 0.0  ;;  %v1261_v30 = vadd.f32 %v2630_v20, %v3496_v5  ;;  %2739 = vmatmul.mubr.bf16.gmra.mrb[76].mxu1 %v1426_v25 }
 0x186   : > { %v1418_v34 = vmax.f32 %v1390_v12, 0.0 }
 0x187   : > { %v1430_v21 = vpack.c.bf16 %v1420_v41, %v1419_v28  ;;  %v1374_v35 = vadd.f32 %v1373_v1, %v1261_v30  ;;  %v2631_v36 = vpop.f32.mrb[68].mxu0  ;;  %v1413_v38 = vmax.f32 %v1371_v29, 0.0 }
 0x188   : > { %v1429_v37 = vpack.c.bf16 %v1418_v34, %v1417_v31  ;;  %v2632_v4 = vpop.f32.mrb[69].mxu0 }
 0x189   : > { %v1414_v44 = vmax.f32 %v1374_v35, 0.0  ;;  %v2633_v39 = vadd.f32 %v2632_v4, %v2631_v36  ;;  %v2634_v26 = vpop.f32.mrb[70].mxu0 }
 0x18a   : > { %v2635_v40 = vpop.f32.mrb[71].mxu0 }
 0x18b   : > { %v1266_v22 = vadd.f32 %v2633_v39, %v3500_v23  ;;  %v2636_v10 = vadd.f32 %v2635_v40, %v2634_v26  ;;  %v1427_v27 = vpack.c.bf16 %v1414_v44, %v1413_v38  ;;  %v3542_v23 = vld [vmem:[%s3700_s4] ss:$0 sm:$0xff] }
 0x18d   : > { %v1379_v45 = vadd.f32 %v2708_v55, %v1266_v22  ;;  %v1269_v5 = vadd.f32 %v2636_v10, %v3502_v24  ;;  %2742 = vmatprep.mubr.bf16.mxu1 %v1427_v27 }
 0x18f   : > { %v1382_v46 = vadd.f32 %v2709_v63, %v1269_v5  ;;  %v1415_v47 = vmax.f32 %v1379_v45, 0.0 }
 0x191   : > { %v1416_v14 = vmax.f32 %v1382_v46, 0.0 }
 0x193   : > { %v1428_v48 = vpack.c.bf16 %v1416_v14, %v1415_v47 }
 0x195   : > { %2743 = vmatmul.mubr.bf16.gmra.mrb[80].mxu1 %v1428_v48 }
 0x196   : > { %2746 = vmatprep.mubr.bf16.mxu1 %v1429_v37 }
 0x19d   : > { %2747 = vmatmul.mubr.bf16.gmra.mrb[84].mxu1 %v1430_v21 }
 0x23e   : > { %v2732_v24 = vpop.f32.mrb[68].mxu1 }
 0x23f   : > { %v1545_v52 = vadd.f32 %v2732_v24, %v3542_v23  ;;  %v1536_v53 = vpop.f32.mrb[69].mxu1 }
 0x240   : > { %v1537_v54 = vadd.f32 %v3542_v23, %v1536_v53  ;;  %v2733_v55 = vpop.f32.mrb[70].mxu1 }
 0x241   : > { %v1548_v56 = vadd.f32 %v2733_v55, %v3542_v23  ;;  %v1539_v57 = vpop.f32.mrb[71].mxu1  ;;  %v1617_v42 = vmax.f32 %v1545_v52, 0.0 }
 0x242   : > { %v1540_v60 = vadd.f32 %v3542_v23, %v1539_v57  ;;  %v1615_v62 = vmax.f32 %v1537_v54, 0.0 }
 0x243   : > { %v1618_v61 = vmax.f32 %v1548_v56, 0.0 }
 0x244   : > { %v1616_v63 = vmax.f32 %v1540_v60, 0.0 }
 0x245   : > { %v1636_v43 = vpack.c.bf16 %v1618_v61, %v1617_v42  ;;  %v2294_v42 = vld [vmem:[%s3702_s6] ss:$0 sm:$0xff] }
 0x246   : > { %v1635_v32 = vpack.c.bf16 %v1616_v63, %v1615_v62 }
 0x248   : > { %2758 = vmatprep.mubr.msk.bf16.mxu0 %vm1684_vm1, %v1635_v32  ;;  %v2736_v0 = vpop.f32.mrb[72].mxu1 }
 0x249   : > { %v1561_v1 = vadd.f32 %v2736_v0, %v3542_v23  ;;  %2759 = vmatmul.mubr.msk.bf16.vlgmr.msra.gmra.mrb[72].mxu0 %vm1684_vm1, %v1636_v43  ;;  %v1552_v2 = vpop.f32.mrb[73].mxu1 }
 0x24a   : > { %v1553_v3 = vadd.f32 %v3542_v23, %v1552_v2  ;;  %v2737_v33 = vpop.f32.mrb[74].mxu1 }
 0x24b   : > { %v1564_v6 = vadd.f32 %v2737_v33, %v3542_v23  ;;  %v1555_v8 = vpop.f32.mrb[75].mxu1  ;;  %v1621_v9 = vmax.f32 %v1561_v1, 0.0 }
 0x24c   : > { %v1556_v7 = vadd.f32 %v3542_v23, %v1555_v8  ;;  %v1619_v13 = vmax.f32 %v1553_v3, 0.0 }
 0x24d   : > { %v1622_v11 = vmax.f32 %v1564_v6, 0.0 }
 0x24e   : > { %v1620_v15 = vmax.f32 %v1556_v7, 0.0 }
 0x24f   : > { %v1638_v16 = vpack.c.bf16 %v1622_v11, %v1621_v9 }
 0x250   : > { %v1637_v17 = vpack.c.bf16 %v1620_v15, %v1619_v13 }
 0x252   : > { %2762 = vmatprep.mubr.msk.bf16.mxu0 %vm1684_vm1, %v1637_v17 }
 0x253   : > { %2763 = vmatmul.mubr.msk.bf16.gmra.mrb[76].mxu0 %vm1684_vm1, %v1638_v16 }
 0x258   : > { %v2740_v18 = vpop.f32.mrb[76].mxu1 }
 0x259   : > { %v1577_v50 = vadd.f32 %v2740_v18, %v3542_v23  ;;  %v1568_v58 = vpop.f32.mrb[77].mxu1 }
 0x25a   : > { %v1569_v19 = vadd.f32 %v3542_v23, %v1568_v58  ;;  %v2741_v51 = vpop.f32.mrb[78].mxu1 }
 0x25b   : > { %v1580_v20 = vadd.f32 %v2741_v51, %v3542_v23  ;;  %v1571_v59 = vpop.f32.mrb[79].mxu1  ;;  %v1625_v25 = vmax.f32 %v1577_v50, 0.0 }
 0x25c   : > { %v1572_v12 = vadd.f32 %v3542_v23, %v1571_v59  ;;  %v1623_v29 = vmax.f32 %v1569_v19, 0.0 }
 0x25d   : > { %v1626_v28 = vmax.f32 %v1580_v20, 0.0 }
 0x25e   : > { %v1624_v41 = vmax.f32 %v1572_v12, 0.0 }
 0x25f   : > { %v1640_v30 = vpack.c.bf16 %v1626_v28, %v1625_v25 }
 0x260   : > { %v1639_v31 = vpack.c.bf16 %v1624_v41, %v1623_v29 }
 0x262   : > { %2766 = vmatprep.mubr.msk.bf16.mxu0 %vm1684_vm1, %v1639_v31 }
 0x263   : > { %2767 = vmatmul.mubr.msk.bf16.gmra.mrb[80].mxu0 %vm1684_vm1, %v1640_v30 }
 0x268   : > { %v2744_v34 = vpop.f32.mrb[80].mxu1 }
 0x269   : > { %v1593_v21 = vadd.f32 %v2744_v34, %v3542_v23  ;;  %v1584_v35 = vpop.f32.mrb[81].mxu1 }
 0x26a   : > { %v1585_v36 = vadd.f32 %v3542_v23, %v1584_v35  ;;  %v2745_v37 = vpop.f32.mrb[82].mxu1 }
 0x26b   : > { %v1596_v4 = vadd.f32 %v2745_v37, %v3542_v23  ;;  %v1587_v38 = vpop.f32.mrb[83].mxu1  ;;  %v1629_v39 = vmax.f32 %v1593_v21, 0.0 }
 0x26c   : > { %v1588_v44 = vadd.f32 %v3542_v23, %v1587_v38  ;;  %v1627_v40 = vmax.f32 %v1585_v36, 0.0 }
 0x26d   : > { %v1630_v26 = vmax.f32 %v1596_v4, 0.0 }
 0x26e   : > { %v1628_v22 = vmax.f32 %v1588_v44, 0.0 }
 0x26f   : > { %v1642_v10 = vpack.c.bf16 %v1630_v26, %v1629_v39 }
 0x270   : > { %v1641_v27 = vpack.c.bf16 %v1628_v22, %v1627_v40  ;;  %v2748_v45 = vpop.f32.mrb[84].mxu1 }
 0x271   : > { %v1609_v5 = vadd.f32 %v2748_v45, %v3542_v23  ;;  %v1600_v46 = vpop.f32.mrb[85].mxu1 }
 0x272   : > { %v1601_v47 = vadd.f32 %v3542_v23, %v1600_v46  ;;  %v2749_v14 = vpop.f32.mrb[86].mxu1  ;;  %2770 = vmatprep.mubr.msk.bf16.mxu0 %vm1684_vm1, %v1641_v27 }
 0x273   : > { %v1612_v48 = vadd.f32 %v2749_v14, %v3542_v23  ;;  %v1603_v49 = vpop.f32.mrb[87].mxu1  ;;  %2771 = vmatmul.mubr.msk.bf16.gmra.mrb[84].mxu0 %vm1684_vm1, %v1642_v10  ;;  %v1633_v52 = vmax.f32 %v1609_v5, 0.0 }
 0x274   : > { %v1604_v24 = vadd.f32 %v3542_v23, %v1603_v49  ;;  %v1631_v54 = vmax.f32 %v1601_v47, 0.0 }
 0x275   : > { %v1634_v53 = vmax.f32 %v1612_v48, 0.0 }
 0x276   : > { %v1632_v55 = vmax.f32 %v1604_v24, 0.0 }
 0x277   : > { %v1644_v56 = vpack.c.bf16 %v1634_v53, %v1633_v52 }
 0x278   : > { %v1643_v57 = vpack.c.bf16 %v1632_v55, %v1631_v54 }
 0x27a   : > { %2774 = vmatprep.mubr.msk.bf16.mxu0 %vm1684_vm1, %v1643_v57 }
 0x27b   : > { %2775 = vmatmul.mubr.msk.bf16.gmra.mrb[88].mxu0 %vm1684_vm1, %v1644_v56 }
 0x31c   : > { %v2760_v60 = vpop.f32.mrb[72].mxu0 }
 0x31d   : > { %v1749_v61 = vpop.f32.mrb[73].mxu0  ;;  %v1758_v23 = vadd.f32 %v2760_v60, %v2294_v42 }
 0x31e   : > { %v2761_v62 = vpop.f32.mrb[74].mxu0  ;;  %v1750_v32 = vadd.f32 %v2294_v42, %v1749_v61 }
 0x31f   : > { %v1761_v63 = vadd.f32 %v2761_v62, %v2294_v42  ;;  %v1752_v43 = vpop.f32.mrb[75].mxu0 }
 0x320   : > { %v1753_v0 = vadd.f32 %v2294_v42, %v1752_v43 }
 0x321   : > { %v2370_v1 = vpack.c.bf16 %v1761_v63, %v1758_v23 }
 0x322   : > { %v2365_v2 = vpack.c.bf16 %v1753_v0, %v1750_v32 }
 0x323   : > { %2412 = vst [vmem:[%s3578_s18 + $0x8] sm:$0xff] %v2370_v1  }
 0x324   : > { %2366 = vst [vmem:[%s3578_s18] sm:$0xff] %v2365_v2  }
 0x326   : > { %v2764_v3 = vpop.f32.mrb[76].mxu0 }
 0x327   : > { %v1765_v33 = vpop.f32.mrb[77].mxu0  ;;  %v1774_v8 = vadd.f32 %v2764_v3, %v2294_v42 }
 0x328   : > { %v2765_v6 = vpop.f32.mrb[78].mxu0  ;;  %v1766_v11 = vadd.f32 %v2294_v42, %v1765_v33 }
 0x329   : > { %v1777_v7 = vadd.f32 %v2765_v6, %v2294_v42  ;;  %v1768_v9 = vpop.f32.mrb[79].mxu0 }
 0x32a   : > { %v1769_v13 = vadd.f32 %v2294_v42, %v1768_v9 }
 0x32b   : > { %v2380_v15 = vpack.c.bf16 %v1777_v7, %v1774_v8 }
 0x32c   : > { %v2375_v16 = vpack.c.bf16 %v1769_v13, %v1766_v11 }
 0x32d   : > { %2414 = vst [vmem:[%s3578_s18 + $0x18] sm:$0xff] %v2380_v15  }
 0x32e   : > { %2413 = vst [vmem:[%s3578_s18 + $0x10] sm:$0xff] %v2375_v16  }
 0x336   : > { %v2768_v17 = vpop.f32.mrb[80].mxu0 }
 0x337   : > { %v1781_v18 = vpop.f32.mrb[81].mxu0  ;;  %v1790_v58 = vadd.f32 %v2768_v17, %v2294_v42 }
 0x338   : > { %v2769_v50 = vpop.f32.mrb[82].mxu0  ;;  %v1782_v20 = vadd.f32 %v2294_v42, %v1781_v18 }
 0x339   : > { %v1793_v19 = vadd.f32 %v2769_v50, %v2294_v42  ;;  %v1784_v51 = vpop.f32.mrb[83].mxu0 }
 0x33a   : > { %v1785_v59 = vadd.f32 %v2294_v42, %v1784_v51 }
 0x33b   : > { %v2390_v12 = vpack.c.bf16 %v1793_v19, %v1790_v58 }
 0x33c   : > { %v2385_v25 = vpack.c.bf16 %v1785_v59, %v1782_v20 }
 0x33d   : > { %2416 = vst [vmem:[%s3578_s18 + $0x28] sm:$0xff] %v2390_v12  }
 0x33e   : > { %2415 = vst [vmem:[%s3578_s18 + $0x20] sm:$0xff] %v2385_v25  }
 0x346   : > { %v2772_v28 = vpop.f32.mrb[84].mxu0 }
 0x347   : > { %v1797_v29 = vpop.f32.mrb[85].mxu0  ;;  %v1806_v30 = vadd.f32 %v2772_v28, %v2294_v42 }
 0x348   : > { %v2773_v41 = vpop.f32.mrb[86].mxu0  ;;  %v1798_v21 = vadd.f32 %v2294_v42, %v1797_v29 }
 0x349   : > { %v1809_v31 = vadd.f32 %v2773_v41, %v2294_v42  ;;  %v1800_v34 = vpop.f32.mrb[87].mxu0 }
 0x34a   : > { %v1801_v35 = vadd.f32 %v2294_v42, %v1800_v34 }
 0x34b   : > { %v2400_v36 = vpack.c.bf16 %v1809_v31, %v1806_v30 }
 0x34c   : > { %v2395_v37 = vpack.c.bf16 %v1801_v35, %v1798_v21 }
 0x34d   : > { %2418 = vst [vmem:[%s3578_s18 + $0x38] sm:$0xff] %v2400_v36  }
 0x34e   : > { %2417 = vst [vmem:[%s3578_s18 + $0x30] sm:$0xff] %v2395_v37   ;;  %v2776_v4 = vpop.f32.mrb[88].mxu0 }
 0x34f   : > { %v1813_v38 = vpop.f32.mrb[89].mxu0  ;;  %v1822_v39 = vadd.f32 %v2776_v4, %v2294_v42 }
 0x350   : > { %v2777_v44 = vpop.f32.mrb[90].mxu0  ;;  %v1814_v22 = vadd.f32 %v2294_v42, %v1813_v38  ;;  %1934 = sbr.rel (!%p3103_p4) target bundleno = 930 (0x3a2), region = 52 }
 0x351   : > { %v1825_v26 = vadd.f32 %v2777_v44, %v2294_v42  ;;  %v1816_v40 = vpop.f32.mrb[91].mxu0 }
 0x352   : > { %v1817_v10 = vadd.f32 %v2294_v42, %v1816_v40 }
 0x353   : > { %v2410_v27 = vpack.c.bf16 %v1825_v26, %v1822_v39 }
 0x354   : > { %v2405_v45 = vpack.c.bf16 %v1817_v10, %v1814_v22 }
 0x355   : > { %2420 = vst [vmem:[%s3578_s18 + $0x48] sm:$0xff] %v2410_v27  }
 0x356   : > { %2419 = vst [vmem:[%s3578_s18 + $0x40] sm:$0xff] %v2405_v45  }
 0x357   : > { %s3712_s24 = smov (!%p1937_p8, %s1936_s24), 20 }
 0x358   : > { %s2329_s22 = sshll.u32 %s3712_s24, 6 }
 0x359   : > { %p2332_p9 = scmp.eq.s32.totalorder %s2329_s22, 0 }
 0x35a   : > { %2946 = sdivrem.u32 (!%p2332_p9), %s3712_s24, 20 }
 0x35b   : > { %1945 = sbr.rel (%p2332_p9) target bundleno = 930 (0x3a2), region = 56 }
 0x363   : > { %s3603_s9 = spop.drf %2946 }
 0x364   : > { %p2333_p10 = scmp.le.s32.totalorder %s3603_s9, 0 }
 0x365   : > { %s3705_s27 = smov (!%p2333_p10), %s3597_s26  ;;  %s3706_s21 = smov (!%p2333_p10), %s3578_s18 }
 0x366   : > { %2176 = sbr.rel (%p2333_p10) target bundleno = 901 (0x385), region = 128  ;;  %s3612_s30 = smov (!%p2333_p10), 0  }
 0x367   : > { %s3614_s29 = smov (!%p2333_p10), 0  }
 0x36d LB: >> { %v1962_v5 = vld [vmem:[%s3012_s21] sm:$0xf]  ;;  %v1964_v46 = vld [vmem:[%s3012_s21 + $0x4] sm:$0xf]  ;;  %v1966_v47 = vld [vmem:[%s3012_s21 + $0x8] sm:$0xf]  ;;  %s3020_s29 = sphi %s3614_s29, %s1956_s29   ;;  %s3016_s30 = sphi %s3612_s30, %s3707_s30   ;;  %s3012_s21 = sphi %s3706_s21, %s2007_s21   ;;  %s3008_s27 = sphi %s3705_s27, %s2008_s27  }
 0x36e   : >> { %1963 = vst [vmem:[%s3008_s27] sm:$0xf] %v1962_v5  ;;  %1965 = vst [vmem:[%s3008_s27 + $0x4] sm:$0xf] %v1964_v46  ;;  %v1968_v14 = vld [vmem:[%s3012_s21 + $0xc] sm:$0xf]  ;;  %s2002_s10 = sadd.s32 1, %s3016_s30 }
 0x36f   : >> { %1967 = vst [vmem:[%s3008_s27 + $0x8] sm:$0xf] %v1966_v47  ;;  %v1970_v48 = vld [vmem:[%s3012_s21 + $0x10] sm:$0xf]  ;;  %v1972_v49 = vld [vmem:[%s3012_s21 + $0x14] sm:$0xf]  ;;  %p2003_p11 = scmp.ge.s32.totalorder %s2002_s10, %s3603_s9 }
 0x370   : >> { %1969 = vst [vmem:[%s3008_s27 + $0xc] sm:$0xf] %v1968_v14  ;;  %1971 = vst [vmem:[%s3008_s27 + $0x10] sm:$0xf] %v1970_v48  ;;  %v1974_v24 = vld [vmem:[%s3012_s21 + $0x18] sm:$0xf] }
 0x371   : >> { %1973 = vst [vmem:[%s3008_s27 + $0x14] sm:$0xf] %v1972_v49  ;;  %v1976_v52 = vld [vmem:[%s3012_s21 + $0x1c] sm:$0xf]  ;;  %v1978_v53 = vld [vmem:[%s3012_s21 + $0x20] sm:$0xf] }
 0x372   : >> { %1975 = vst [vmem:[%s3008_s27 + $0x18] sm:$0xf] %v1974_v24  ;;  %1977 = vst [vmem:[%s3008_s27 + $0x1c] sm:$0xf] %v1976_v52  ;;  %v1980_v54 = vld [vmem:[%s3012_s21 + $0x24] sm:$0xf] }
 0x373   : >> { %1979 = vst [vmem:[%s3008_s27 + $0x20] sm:$0xf] %v1978_v53  ;;  %v1982_v55 = vld [vmem:[%s3012_s21 + $0x28] sm:$0xf]  ;;  %v1984_v56 = vld [vmem:[%s3012_s21 + $0x2c] sm:$0xf] }
 0x374   : >> { %1981 = vst [vmem:[%s3008_s27 + $0x24] sm:$0xf] %v1980_v54  ;;  %1983 = vst [vmem:[%s3008_s27 + $0x28] sm:$0xf] %v1982_v55  ;;  %v1986_v57 = vld [vmem:[%s3012_s21 + $0x30] sm:$0xf] }
 0x375   : >> { %1985 = vst [vmem:[%s3008_s27 + $0x2c] sm:$0xf] %v1984_v56  ;;  %v1988_v60 = vld [vmem:[%s3012_s21 + $0x34] sm:$0xf]  ;;  %v1990_v42 = vld [vmem:[%s3012_s21 + $0x38] sm:$0xf] }
 0x376   : >> { %1987 = vst [vmem:[%s3008_s27 + $0x30] sm:$0xf] %v1986_v57  ;;  %1989 = vst [vmem:[%s3008_s27 + $0x34] sm:$0xf] %v1988_v60  ;;  %v1992_v61 = vld [vmem:[%s3012_s21 + $0x3c] sm:$0xf] }
 0x377   : >> { %1991 = vst [vmem:[%s3008_s27 + $0x38] sm:$0xf] %v1990_v42  ;;  %v1994_v62 = vld [vmem:[%s3012_s21 + $0x40] sm:$0xf]  ;;  %v1996_v23 = vld [vmem:[%s3012_s21 + $0x44] sm:$0xf] }
 0x378   : >> { %1993 = vst [vmem:[%s3008_s27 + $0x3c] sm:$0xf] %v1992_v61  ;;  %1995 = vst [vmem:[%s3008_s27 + $0x40] sm:$0xf] %v1994_v62  ;;  %v1998_v63 = vld [vmem:[%s3012_s21 + $0x48] sm:$0xf] }
 0x379   : >> { %1997 = vst [vmem:[%s3008_s27 + $0x44] sm:$0xf] %v1996_v23  ;;  %v2000_v43 = vld [vmem:[%s3012_s21 + $0x4c] sm:$0xf]  ;;  %1999 = vst [vmem:[%s3008_s27 + $0x48] sm:$0xf] %v1998_v63 }
 0x37a   : >> { %2001 = vst [vmem:[%s3008_s27 + $0x4c] sm:$0xf] %v2000_v43  ;;  %s3714_s10 = smov (%p2003_p11, %s2002_s10), 0  ;;  %s1956_s29 = sadd.s32 1, %s3020_s29  }
 0x37b   : >> { %s2005_s11 = smul.u32 80, %s3714_s10  ;;  %p1955_p12 = scmp.ge.s32.totalorder %s1956_s29, %s3603_s9 }
 0x37c   : >> { %s3707_s30 = smov %s3714_s10 }
 0x37d   : >> { %s2007_s21 = scalar_lea.vmem %s3578_s18, %s2005_s11 [#allocation2]   ;;  %s2008_s27 = scalar_lea.vmem %s3597_s26, %s2005_s11  }
 0x37e   : > { %1958 = sbr.rel (!%p1955_p12) target bundleno = 877 (0x36d), region = 134 }
 0x385 PF: > { %2948 = sdivrem.u32 %s3712_s24, 20 }
 0x386   : > { %s2334_s12 = smul.u32 80, %s3603_s9 }
 0x388   : > { %s2013_s13 = scalar_lea.vmem %s3578_s18, %s2334_s12 [#allocation2]   ;;  %s2015_s14 = scalar_lea.vmem %s3597_s26, %s2334_s12  }
 0x38e   : > { %s2949_s15 = spop.drf %2948 }
 0x38f   : > { %p2336_p13 = scmp.le.s32.totalorder %s2949_s15, 0 }
 0x390   : > { %s3022_s16 = smov (!%p2336_p13), %s2015_s14   ;;  %s3026_s17 = smov (!%p2336_p13), %s2013_s13  }
 0x391   : > { %2190 = sbr.rel (%p2336_p13) target bundleno = 930 (0x3a2), region = 139  ;;  %s3030_s19 = smov (!%p2336_p13), 0  }
 0x392   : > { %s3034_s20 = smov (!%p2336_p13), 0  }
 0x398 LB: >> { %v2025_v32 = vld [vmem:[%s3028_s17] sm:$0xf]  ;;  %s2027_s23 = sadd.s32 1, %s3032_s19  ;;  %s2019_s20 = sadd.s32 1, %s3036_s20   ;;  %s3036_s20 = sphi %s3034_s20, %s2019_s20   ;;  %s3032_s19 = sphi %s3030_s19, %s3031_s19   ;;  %s3028_s17 = sphi %s3026_s17, %s2032_s17   ;;  %s3024_s16 = sphi %s3022_s16, %s2033_s16  }
 0x399   : >> { %2026 = vst [vmem:[%s3024_s16] sm:$0xf] %v2025_v32  ;;  %p2028_p0 = scmp.ge.s32.totalorder %s2027_s23, %s2949_s15  ;;  %p2018_p1 = scmp.ge.s32.totalorder %s2019_s20, %s2949_s15 }
 0x39b   : >> { %s3716_s23 = smov (%p2028_p0, %s2027_s23), 0  ;;  %2021 = sbr.rel (!%p2018_p1) target bundleno = 920 (0x398), region = 145 }
 0x39c   : >> { %s2337_s18 = sshll.u32 %s3716_s23, 2  ;;  %s3031_s19 = smov %s3716_s23  }
 0x39d   : >> { %s2032_s17 = scalar_lea.vmem %s2013_s13, %s2337_s18 [#allocation2]   ;;  %s2033_s16 = scalar_lea.vmem %s2015_s14, %s2337_s18  }
 0x3a2 PF: > { %p14_p2 = scmp.ge.s32.totalorder %s3093_s28, 4   ;;  %s3708_s24 = smov %s3000_s25 }
 0x3a3   : > { %s3709_s25 = smov %s3101_s8  ;;  %s3710_s26 = smov %s3093_s28 }
 0x3a4   :  { %16 = sbr.rel (!%p14_p2) target bundleno = 2 (0x2), region = 156 }

</bundles_post_ra>
